<compile_context>
chip_gen: v7x
topology: tpu7x:2x2x1
jax: 0.10.0
libtpu: 0.0.40
codegen_flags: <defaults>
</compile_context>

<pallas_src>
import functools

import jax
import jax.numpy as jnp
from jax.experimental import pallas as pl
from jax.experimental.pallas import tpu as pltpu


# ---------------------------------------------------------------------------
# Sigmoid with a single transcendental push: sigmoid(x) = 0.5*tanh(0.5*x) + 0.5.
# (jax.nn.sigmoid lowers to exp + divide = two EUP pushes per element.)
# ---------------------------------------------------------------------------
def _sigmoid1(x):
    half = jnp.asarray(0.5, dtype=x.dtype)
    return half * jnp.tanh(x * half) + half


# ---------------------------------------------------------------------------
# Kernels
# ---------------------------------------------------------------------------
def _resident_kernel(x_ref, w1_ref, w2_ref, o_ref, act_ref, *, hidden_dtype):
    """Weight-resident path.  Grid = (m_tiles, num_layers).

    w1_ref: (L, d_emb, d_ff) full stack in VMEM (constant block index -> one DMA total)
    w2_ref: (L, d_ff, d_emb) full stack in VMEM
    act_ref: (tm, d_emb) bf16 scratch, activation resident across layers
    """
    l = pl.program_id(1)

    @pl.when(l == 0)
    def _load_x():
        act_ref[...] = x_ref[...]

    h = jnp.dot(act_ref[...], w1_ref[l], preferred_element_type=jnp.float32)
    h = _sigmoid1(h.astype(hidden_dtype)).astype(jnp.bfloat16)
    y = jnp.dot(h, w2_ref[l], preferred_element_type=jnp.float32)
    act_ref[...] = _sigmoid1(y.astype(hidden_dtype)).astype(jnp.bfloat16)

    @pl.when(l == pl.num_programs(1) - 1)
    def _store_out():
        o_ref[...] = act_ref[...]


def _chunked_kernel(x_ref, w1_ref, w2_ref, o_ref, act_ref, acc_ref, *, hidden_dtype):
    """Weight-streaming path.  Grid = (m_tiles, num_layers, ff_chunks).

    act_ref : (tm, d_emb) bf16 scratch, activation resident across layers
    acc_ref : (tm, d_emb) f32 scratch, per-layer output accumulator over d_ff chunks
    """
    l = pl.program_id(1)
    f = pl.program_id(2)
    n_f = pl.num_programs(2)

    @pl.when(jnp.logical_and(l == 0, f == 0))
    def _load_x():
        act_ref[...] = x_ref[...]

    # First matmul (this d_ff chunk) + sigmoid.  Chunks are disjoint columns of W1,
    # so each hidden element is fully computed inside its chunk.
    h = jnp.dot(act_ref[...], w1_ref[...], preferred_element_type=jnp.float32)
    h = _sigmoid1(h.astype(hidden_dtype)).astype(jnp.bfloat16)

    # Second matmul: this chunk's contribution to the layer output (f32).
    contrib = jnp.dot(h, w2_ref[...], preferred_element_type=jnp.float32)

    @pl.when(f == 0)
    def _init_acc():          # first chunk writes directly (no zero-init + RMW)
        acc_ref[...] = contrib

    @pl.when(f > 0)
    def _accum():
        acc_ref[...] += contrib

    @pl.when(f == n_f - 1)
    def _finish_layer():
        act_ref[...] = _sigmoid1(acc_ref[...].astype(hidden_dtype)).astype(jnp.bfloat16)

    @pl.when(jnp.logical_and(l == pl.num_programs(1) - 1, f == n_f - 1))
    def _store_out():
        o_ref[...] = act_ref[...]


# ---------------------------------------------------------------------------
# Generation-aware configuration / tiling
# ---------------------------------------------------------------------------
def _tpu_config():
    try:
        kind = jax.devices()[0].device_kind.lower()
    except Exception:  # pragma: no cover - defensive
        kind = ""
    if "v7" in kind:
        return dict(vmem_cap=56 << 20, preferred_tm=512, preferred_tff=1024,
                    two_cores=True, hidden_dtype=jnp.bfloat16)
    if "v6" in kind:
        return dict(vmem_cap=96 << 20, preferred_tm=768, preferred_tff=2048,
                    two_cores=False, hidden_dtype=jnp.bfloat16)
    if "v5" in kind:
        # v5e: no bf16 EUP/VPU -> keep sigmoid math in f32; 128-edge MXU -> tm=256.
        return dict(vmem_cap=96 << 20, preferred_tm=256, preferred_tff=2048,
                    two_cores=False, hidden_dtype=jnp.float32)
    # Unknown chip: conservative (fits v7x's 64 MiB VMEM, f32 transcendentals).
    return dict(vmem_cap=56 << 20, preferred_tm=256, preferred_tff=1024,
                two_cores=False, hidden_dtype=jnp.float32)


def _round_up(x, m):
    return ((x + m - 1) // m) * m


def _pick_m_tile(m, preferred, two_cores):
    """Row-tile size.  Full M when small; on v7x force >=2 tiles so both TCs work."""
    if two_cores and m > 8:
        tm = min(preferred, _round_up(-(-m // 2), 8))   # ceil(m/2), 8-aligned
    elif m <= preferred:
        return m                                         # full-extent block is legal
    else:
        tm = _round_up(preferred, 8)
    return max(8, min(tm, _round_up(m, 8)))


def _pick_ff_tile(d_ff, preferred, fits_fn):
    """Largest 128-aligned divisor of d_ff (<= preferred) whose VMEM estimate fits."""
    cands = []
    if d_ff <= preferred:
        cands.append(d_ff)
    t = (min(preferred, d_ff) // 128) * 128
    while t >= 128:
        if d_ff % t == 0 and t not in cands:
            cands.append(t)
        t -= 128
    if not cands:
        cands.append(d_ff)     # no aligned divisor; run unchunked
    for c in cands:            # descending
        if fits_fn(c):
            return c
    return cands[-1]


# ---------------------------------------------------------------------------
# Forward pass
# ---------------------------------------------------------------------------
@jax.jit
def model_forward(x, w1_stack, w2_stack):
    """x: [batch, seq, d_emb] bf16 -> [batch, seq, d_emb] bf16.

    w1_stack: [L, d_emb, d_ff] bf16 (EMB2FF weight, pre-transposed)
    w2_stack: [L, d_ff, d_emb] bf16 (FF2EMB weight, pre-transposed)
    """
    batch, seq, d_emb = x.shape
    num_layers, _, d_ff = w1_stack.shape
    m = batch * seq
    x2d = x.reshape(m, d_emb)

    cfg = _tpu_config()
    hidden_dtype = cfg["hidden_dtype"]
    cap = cfg["vmem_cap"]
    tm = _pick_m_tile(m, cfg["preferred_tm"], cfg["two_cores"])
    m_tiles = pl.cdiv(m, tm)

    weight_bytes = num_layers * 2 * d_emb * d_ff * 2     # bf16 W1 + W2
    io_bytes = 4 * tm * d_emb * 2                        # x + out blocks, double-buffered
    act_bytes = tm * d_emb * 2                           # resident activation scratch
    h_bytes = tm * d_ff * 6                              # f32 dot result + bf16 hidden copy

    # --- weight-resident fast path: whole weight stack lives in VMEM ------------
    resident_est = 2 * weight_bytes + io_bytes + act_bytes + h_bytes
    use_resident = resident_est <= int(0.6 * cap)

    if use_resident:
        est = resident_est
        vmem_limit = None if est <= (12 << 20) else min(cap, max(int(est * 1.5), 32 << 20))
        out2d = pl.pallas_call(
            functools.partial(_resident_kernel, hidden_dtype=hidden_dtype),
            out_shape=jax.ShapeDtypeStruct((m, d_emb), jnp.bfloat16),
            grid_spec=pltpu.PrefetchScalarGridSpec(
                num_scalar_prefetch=0,
                grid=(m_tiles, num_layers),
                in_specs=[
                    # activation tile: constant across the layer axis -> fetched once per i
                    pl.BlockSpec((tm, d_emb), lambda i, l: (i, 0)),
                    # full weight stacks, index map independent of i/l -> one DMA total
                    pl.BlockSpec((num_layers, d_emb, d_ff), lambda i, l: (0, 0, 0)),
                    pl.BlockSpec((num_layers, d_ff, d_emb), lambda i, l: (0, 0, 0)),
                ],
                out_specs=pl.BlockSpec((tm, d_emb), lambda i, l: (i, 0)),
                scratch_shapes=[pltpu.VMEM((tm, d_emb), jnp.bfloat16)],
            ),
            compiler_params=pltpu.CompilerParams(
                dimension_semantics=("parallel", "arbitrary"),
                vmem_limit_bytes=vmem_limit,
            ),
        )(x2d, w1_stack, w2_stack)
        return out2d.reshape(batch, seq, d_emb)

    # --- streaming path: weights streamed per layer, d_ff chunked ---------------
    def est_fn(tff):
        return (io_bytes + act_bytes
                + tm * d_emb * 4            # f32 accumulator scratch
                + 4 * d_emb * tff * 2       # W1 + W2 chunks, double-buffered, bf16
                + tm * tff * 6)             # f32 dot result + bf16 hidden copy

    budget = int(0.8 * cap)
    tff = _pick_ff_tile(d_ff, cfg["preferred_tff"], lambda t: est_fn(t) <= budget)
    ff_chunks = d_ff // tff
    est = est_fn(tff)
    vmem_limit = None if est <= (12 << 20) else min(cap, max(int(est * 1.5), 32 << 20))

    # TODO(synk): if exposed weight DMA shows at layer boundaries on v6e, add
    # pipeline_mode=pl.Buffered(3) on the W1/W2 specs (kept at default depth for safety).
    out2d = pl.pallas_call(
        functools.partial(_chunked_kernel, hidden_dtype=hidden_dtype),
        out_shape=jax.ShapeDtypeStruct((m, d_emb), jnp.bfloat16),
        grid_spec=pltpu.PrefetchScalarGridSpec(
            num_scalar_prefetch=0,
            grid=(m_tiles, num_layers, ff_chunks),
            in_specs=[
                pl.BlockSpec((tm, d_emb), lambda i, l, f: (i, 0)),
                # W1 chunk [l, :, f*tff:(f+1)*tff]  (layer dim squeezed out)
                pl.BlockSpec((None, d_emb, tff), lambda i, l, f: (l, 0, f)),
                # W2 chunk [l, f*tff:(f+1)*tff, :]
                pl.BlockSpec((None, tff, d_emb), lambda i, l, f: (l, f, 0)),
            ],
            out_specs=pl.BlockSpec((tm, d_emb), lambda i, l, f: (i, 0)),
            scratch_shapes=[
                pltpu.VMEM((tm, d_emb), jnp.bfloat16),   # resident activation
                pltpu.VMEM((tm, d_emb), jnp.float32),    # f32 layer-output accumulator
            ],
        ),
        compiler_params=pltpu.CompilerParams(
            dimension_semantics=("parallel", "arbitrary", "arbitrary"),
            vmem_limit_bytes=vmem_limit,
        ),
    )(x2d, w1_stack, w2_stack)

    return out2d.reshape(batch, seq, d_emb)


# ---------------------------------------------------------------------------
# Parameter init (mimics torch.nn.Linear default uniform(-1/sqrt(fan_in), ...))
# ---------------------------------------------------------------------------
def init_params(key, num_layers, d_emb):
    d_ff = 4 * d_emb
    w1s, w2s = [], []
    for _ in range(num_layers):
        key, k1, k2 = jax.random.split(key, 3)
        b1 = 1.0 / (d_emb ** 0.5)
        b2 = 1.0 / (d_ff ** 0.5)
        w1s.append(jax.random.uniform(k1, (d_emb, d_ff), jnp.float32, -b1, b1)
                   .astype(jnp.bfloat16))
        w2s.append(jax.random.uniform(k2, (d_ff, d_emb), jnp.float32, -b2, b2)
                   .astype(jnp.bfloat16))
    return jnp.stack(w1s), jnp.stack(w2s)


if __name__ == "__main__":
    key = jax.random.PRNGKey(0)
    # d_emb multiple of 128 keeps every block lane-dense; M = batch*seq = 128 rows.
    batch, seq, d_emb, num_layers = 2, 64, 128, 3

    kx, kp = jax.random.split(key)
    x = jax.random.normal(kx, (batch, seq, d_emb), jnp.float32).astype(jnp.bfloat16)
    w1s, w2s = init_params(kp, num_layers, d_emb)

    out = jax.block_until_ready(model_forward(x, w1s, w2s))

    # Reference in plain JAX with the same precision path as the kernel
    # (f32 MXU accumulation, sigmoid applied at the kernel's hidden dtype).
    hdt = _tpu_config()["hidden_dtype"]
    ref = x.reshape(batch * seq, d_emb)
    for l in range(num_layers):
        h = jnp.dot(ref, w1s[l], preferred_element_type=jnp.float32).astype(hdt)
        h = jax.nn.sigmoid(h).astype(jnp.bfloat16)
        y = jnp.dot(h, w2s[l], preferred_element_type=jnp.float32).astype(hdt)
        ref = jax.nn.sigmoid(y).astype(jnp.bfloat16)
    ref = ref.reshape(batch, seq, d_emb)

    assert out.shape == (batch, seq, d_emb) and out.dtype == jnp.bfloat16
    err = float(jnp.max(jnp.abs(out.astype(jnp.float32) - ref.astype(jnp.float32))))
    assert err < 2e-2, f"max abs error {err}"

    print("KERNEL_OK")
</pallas_src>

<mosaic_0001>
module attributes {stable_mosaic.version = 11 : i64} {
  func.func @_resident_kernel(%arg0: i32, %arg1: i32, %arg2: memref<128x128xbf16, #tpu.memory_space<vmem>>, %arg3: memref<3x128x512xbf16, #tpu.memory_space<vmem>>, %arg4: memref<3x512x128xbf16, #tpu.memory_space<vmem>>, %arg5: memref<128x128xbf16, #tpu.memory_space<vmem>>, %arg6: memref<128x128xbf16, #tpu.memory_space<vmem>>) attributes {dimension_semantics = [#tpu.dimension_semantics<parallel>, #tpu.dimension_semantics<arbitrary>], iteration_bounds = array<i64: 1, 3>, scalar_prefetch = 0 : i64, scratch_operands = 1 : i64, tpu.core_type = #tpu.core_type<tc>, window_params = [{transform_indices = @transform_0, window_bounds = array<i64: 128, 128>}, {pipeline_mode = #tpu.pipeline_mode<synchronous>, transform_indices = @transform_1, window_bounds = array<i64: 3, 128, 512>}, {pipeline_mode = #tpu.pipeline_mode<synchronous>, transform_indices = @transform_2, window_bounds = array<i64: 3, 512, 128>}, {transform_indices = @transform_3, window_bounds = array<i64: 128, 128>}]} {
    %c0_i32 = arith.constant 0 : i32
    %0 = arith.cmpi eq, %arg1, %c0_i32 : i32
    %1 = arith.extui %0 : i1 to i32
    %c0_i32_0 = arith.constant 0 : i32
    %2 = arith.cmpi ne, %1, %c0_i32_0 : i32
    scf.if %2 {
      %c0_16 = arith.constant 0 : index
      %c0_17 = arith.constant 0 : index
      %32 = vector.load %arg2[%c0_16, %c0_17] : memref<128x128xbf16, #tpu.memory_space<vmem>>, vector<128x128xbf16>
      %c0_18 = arith.constant 0 : index
      %c0_19 = arith.constant 0 : index
      %33 = vector.load %arg6[%c0_18, %c0_19] : memref<128x128xbf16, #tpu.memory_space<vmem>>, vector<128x128xbf16>
      tpu.vector_store %arg6[%c0_18, %c0_19], %32 {strides = array<i32>} : memref<128x128xbf16, #tpu.memory_space<vmem>>, vector<128x128xbf16>,
    } else {
    }
    %c0 = arith.constant 0 : index
    %c0_1 = arith.constant 0 : index
    %3 = vector.load %arg6[%c0, %c0_1] : memref<128x128xbf16, #tpu.memory_space<vmem>>, vector<128x128xbf16>
    %4 = arith.index_cast %arg1 : i32 to index
    %c0_2 = arith.constant 0 : index
    %c0_3 = arith.constant 0 : index
    %5 = vector.load %arg3[%4, %c0_2, %c0_3] : memref<3x128x512xbf16, #tpu.memory_space<vmem>>, vector<1x128x512xbf16>
    %6 = vector.shape_cast %5 : vector<1x128x512xbf16> to vector<128x512xbf16>
    %cst = arith.constant dense<0.000000e+00> : vector<128x512xf32>
    %7 = tpu.matmul %3, %6, %cst {dimension_numbers = #tpu.dot_dimension_numbers<[1], [0], [0], [1], [0, 0, 1, 1], [], []>} : vector<128x128xbf16>, vector<128x512xbf16>, vector<128x512xf32> -> vector<128x512xf32>
    %cst_4 = arith.constant 5.000000e-01 : f32
    %8 = vector.broadcast %cst_4 : f32 to vector<128x512xf32>
    %9 = arith.mulf %7, %8 : vector<128x512xf32>
    %10 = math.tanh %9 : vector<128x512xf32>
    %cst_5 = arith.constant 5.000000e-01 : f32
    %11 = vector.broadcast %cst_5 : f32 to vector<128x512xf32>
    %12 = arith.mulf %11, %10 : vector<128x512xf32>
    %cst_6 = arith.constant 5.000000e-01 : f32
    %13 = vector.broadcast %cst_6 : f32 to vector<128x512xf32>
    %14 = arith.addf %12, %13 : vector<128x512xf32>
    %15 = arith.truncf %14 : vector<128x512xf32> to vector<128x512xbf16>
    %16 = arith.index_cast %arg1 : i32 to index
    %c0_7 = arith.constant 0 : index
    %c0_8 = arith.constant 0 : index
    %17 = vector.load %arg4[%16, %c0_7, %c0_8] : memref<3x512x128xbf16, #tpu.memory_space<vmem>>, vector<1x512x128xbf16>
    %18 = vector.shape_cast %17 : vector<1x512x128xbf16> to vector<512x128xbf16>
    %cst_9 = arith.constant dense<0.000000e+00> : vector<128x128xf32>
    %19 = tpu.matmul %15, %18, %cst_9 {dimension_numbers = #tpu.dot_dimension_numbers<[1], [0], [0], [1], [0, 0, 1, 1], [], []>} : vector<128x512xbf16>, vector<512x128xbf16>, vector<128x128xf32> -> vector<128x128xf32>
    %cst_10 = arith.constant 5.000000e-01 : f32
    %20 = vector.broadcast %cst_10 : f32 to vector<128x128xf32>
    %21 = arith.mulf %19, %20 : vector<128x128xf32>
    %22 = math.tanh %21 : vector<128x128xf32>
    %cst_11 = arith.constant 5.000000e-01 : f32
    %23 = vector.broadcast %cst_11 : f32 to vector<128x128xf32>
    %24 = arith.mulf %23, %22 : vector<128x128xf32>
    %cst_12 = arith.constant 5.000000e-01 : f32
    %25 = vector.broadcast %cst_12 : f32 to vector<128x128xf32>
    %26 = arith.addf %24, %25 : vector<128x128xf32>
    %27 = arith.truncf %26 : vector<128x128xf32> to vector<128x128xbf16>
    %c0_13 = arith.constant 0 : index
    %c0_14 = arith.constant 0 : index
    %28 = vector.load %arg6[%c0_13, %c0_14] : memref<128x128xbf16, #tpu.memory_space<vmem>>, vector<128x128xbf16>
    tpu.vector_store %arg6[%c0_13, %c0_14], %27 {strides = array<i32>} : memref<128x128xbf16, #tpu.memory_space<vmem>>, vector<128x128xbf16>,
    %c2_i32 = arith.constant 2 : i32
    %29 = arith.cmpi eq, %arg1, %c2_i32 : i32
    %30 = arith.extui %29 : i1 to i32
    %c0_i32_15 = arith.constant 0 : i32
    %31 = arith.cmpi ne, %30, %c0_i32_15 : i32
    scf.if %31 {
      %c0_16 = arith.constant 0 : index
      %c0_17 = arith.constant 0 : index
      %32 = vector.load %arg6[%c0_16, %c0_17] : memref<128x128xbf16, #tpu.memory_space<vmem>>, vector<128x128xbf16>
      %c0_18 = arith.constant 0 : index
      %c0_19 = arith.constant 0 : index
      %33 = vector.load %arg5[%c0_18, %c0_19] : memref<128x128xbf16, #tpu.memory_space<vmem>>, vector<128x128xbf16>
      tpu.vector_store %arg5[%c0_18, %c0_19], %32 {strides = array<i32>} : memref<128x128xbf16, #tpu.memory_space<vmem>>, vector<128x128xbf16>,
    } else {
    }
    return
  }
  func.func @transform_0(%arg0: i32, %arg1: i32) -> (i32, i32) {
    %c0_i32 = arith.constant 0 : i32
    %c0_i32_0 = arith.constant 0 : i32
    return %arg0, %c0_i32 : i32, i32
  }
  func.func @transform_1(%arg0: i32, %arg1: i32) -> (i32, i32, i32) {
    %c0_i32 = arith.constant 0 : i32
    %c0_i32_0 = arith.constant 0 : i32
    %c0_i32_1 = arith.constant 0 : i32
    %c0_i32_2 = arith.constant 0 : i32
    return %c0_i32, %c0_i32_0, %c0_i32_1 : i32, i32, i32
  }
  func.func @transform_2(%arg0: i32, %arg1: i32) -> (i32, i32, i32) {
    %c0_i32 = arith.constant 0 : i32
    %c0_i32_0 = arith.constant 0 : i32
    %c0_i32_1 = arith.constant 0 : i32
    %c0_i32_2 = arith.constant 0 : i32
    return %c0_i32, %c0_i32_0, %c0_i32_1 : i32, i32, i32
  }
  func.func @transform_3(%arg0: i32, %arg1: i32) -> (i32, i32) {
    %c0_i32 = arith.constant 0 : i32
    %c0_i32_0 = arith.constant 0 : i32
    return %arg0, %c0_i32 : i32, i32
  }
}

</mosaic_0001>

<bundles_post_ra>
// kernel: model_forward.1
= control target key start
LH: loop header
LB: loop body
LE: loop exit
PB: predicated region body
PF: predicated region fallthrough
CT: control target
= control target key end

     0   :  { %8 = vsyncpa [#allocation4], 0  ;;  %s2725_s0 = inlined_call_operand.hbm [shape: bf16[128,128], index: 0, kind: input, shape index: {}]   ;;  %s2726_s1 = inlined_call_operand.hbm [shape: bf16[3,128,512], index: 1, kind: input, shape index: {}]   ;;  %s2727_s2 = inlined_call_operand.hbm [shape: bf16[3,512,128], index: 2, kind: input, shape index: {}]   ;;  %s2728_s3 = inlined_call_operand.hbm [shape: bf16[128,128], index: 3, kind: output, shape index: {}]  }
   0x1   :  { %9 = vsyncpa [#allocation7], 0 }
   0x2   :  { %10 = vsyncpa [#allocation5], 0  ;;  %s2451_s12 = smov 0   ;;  %s2453_s13 = smov 0  }
   0x3   :  { %s2455_s14 = smov 0  }
   0x4 LB: > { %s2420_s15 = smov [#allocation6]   ;;  %s1705_s17 = sadd.s32 4294967295, %s2418_s14   ;;  %s2418_s14 = sphi %s2455_s14, %s16_s14   ;;  %s2414_s13 = sphi %s2453_s13, %s2741_s13   ;;  %s2410_s12 = sphi %s2451_s12, %s2740_s12  }
   0x5   : > { %s155_s16 = sshll.u32 %s2420_s15, 4  ;;  %p1706_p0 = scmp.ge.s32.totalorder %s2418_s14, 1  ;;  %s2475_s16 = int_to_ptr.vmem [resolvable:$true] %s155_s16 }
   0x6   : > { %p127_p1 = scmp.lt.s32.totalorder %s2418_s14, 4  ;;  %p2471_p2 = scmp.eq.s32.totalorder %s1705_s17, 0 }
   0x7   : > { %s25_s21 = sadd.s32 1, %s2414_s13  ;;  %s2421_s23 = smov [#allocation3]  }
   0x8   : > { %s2732_s18 = scalar_select %p2471_p2, 1, 0 }
   0x9   : > { %p2477_p3 = pnand %p1706_p0, %p127_p1  ;;  %p2490_p6 = scmp.ge.s32.totalorder %s25_s21, 3 }
   0xa   : > { %s142_s24 = sshll.u32 %s2421_s23, 4  ;;  %s2274_s27 = scalar_lea.hbm %s2726_s1, 12288  ;;  %s143_s24 = int_to_ptr.vmem [resolvable:$true] %s142_s24 }
   0xb   : > { %s2733_s19 = scalar_select %p2477_p3, 1, 0 }
   0xc   : > { %p1957_p4 = pneg %p2477_p3  ;;  %p2275_p7 = scmp.ne.s32.totalorder %s2726_s1, %s2274_s27 }
   0xd   : > { %p2281_p11 = scmp.lt.u32.totalorder %s2274_s27, %s2726_s1 }
   0xe   : > { %p2485_p5 = pnand %p2471_p2, %p1957_p4 }
  0x10   : > { %p2502_p8 = pneg %p2485_p5 }
  0x12   : > { %p2277_p9 = pnand %p2502_p8, %p2275_p7 }
  0x14   : > { %p2278_p10 = pneg %p2277_p9 }
  0x16   : > { %p2283_p12 = pnand %p2281_p11, %p2278_p10 }
  0x18   : > { %2286 = shalt.err (!%p2283_p12)
}
  0x19   : > { %s2287_s6 = scalar_lea.vmem %s2475_s16, 12288  ;;  %p2295_p4 = scmp.lt.s32.totalorder %s2475_s16, %s2475_s16 }
  0x1a   : > { %p2288_p13 = scmp.ne.s32.totalorder %s2475_s16, %s2287_s6  ;;  %p2296_p2 = scmp.lt.s32.totalorder %s2287_s6, %s2287_s6 }
  0x1c   : > { %p2290_p0 = pnand %p2288_p13, %p2502_p8  ;;  %p2297_p7 = por %p2296_p2, %p2295_p4 }
  0x1e   : > { %p2291_p1 = pneg %p2290_p0 }
  0x20   : > { %p2298_p9 = pnand %p2297_p7, %p2291_p1 }
  0x22   : > { %2301 = shalt.err (!%p2298_p9)
}
  0x23   : > { %s2422_s7 = smov 256   ;;  %s2423_s8 = smov 16  }
  0x24   : > { %1963 = dma.hbm_to_vmem [thread:$0]  (!%p2485_p5), %s2726_s1, 12288, %s2475_s16, [#allocation7], %s2422_s7, %s2422_s7, %s2423_s8  }
  0x25   : > { %s2743_s21 = smov (%p2490_p6, %s25_s21), 0  ;;  %s2302_s23 = scalar_lea.hbm %s2725_s0, 1024 }
  0x26   : > { %p2303_p2 = scmp.ne.s32.totalorder %s2725_s0, %s2302_s23  ;;  %p2309_p12 = scmp.lt.u32.totalorder %s2302_s23, %s2725_s0 }
  0x28   : > { %p2305_p10 = pnand %p2303_p2, %p2502_p8 }
  0x2a   : > { %p2306_p11 = pneg %p2305_p10 }
  0x2c   : > { %p2311_p13 = pnand %p2309_p12, %p2306_p11 }
  0x2e   : > { %2314 = shalt.err (!%p2311_p13)
}
  0x2f   : > { %s2315_s16 = scalar_lea.vmem %s143_s24, 1024  ;;  %p2323_p4 = scmp.lt.s32.totalorder %s143_s24, %s143_s24 }
  0x30   : > { %p2316_p6 = scmp.ne.s32.totalorder %s143_s24, %s2315_s16  ;;  %p2324_p7 = scmp.lt.s32.totalorder %s2315_s16, %s2315_s16 }
  0x32   : > { %p2318_p0 = pnand %p2316_p6, %p2502_p8  ;;  %p2325_p9 = por %p2324_p7, %p2323_p4 }
  0x34   : > { %p2319_p1 = pneg %p2318_p0 }
  0x36   : > { %p2326_p3 = pnand %p2325_p9, %p2319_p1 }
  0x38   : > { %2329 = shalt.err (!%p2326_p3)
}
  0x39   : > { %s2424_s22 = smov 64   ;;  %s2425_s29 = smov 4  }
  0x3a   : > { %1960 = dma.hbm_to_vmem [thread:$0]  (!%p2485_p5), %s2725_s0, 1024, %s143_s24, [#allocation4], %s2424_s22, %s2424_s22, %s2425_s29  }
  0x3b   : > { %s2426_s6 = smov [#allocation8]   ;;  %s2330_s10 = scalar_lea.hbm %s2727_s2, 12288 }
  0x3c   : > { %s168_s7 = sshll.u32 %s2426_s6, 4  ;;  %p2331_p3 = scmp.ne.s32.totalorder %s2727_s2, %s2330_s10  ;;  %s169_s7 = int_to_ptr.vmem [resolvable:$true] %s168_s7 }
  0x3d   : > { %p2337_p11 = scmp.lt.u32.totalorder %s2330_s10, %s2727_s2 }
  0x3e   : > { %p2333_p2 = pnand %p2331_p3, %p2502_p8 }
  0x40   : > { %p2334_p10 = pneg %p2333_p2 }
  0x42   : > { %p2339_p12 = pnand %p2337_p11, %p2334_p10 }
  0x44   : > { %2342 = shalt.err (!%p2339_p12)
}
  0x45   : > { %s2343_s24 = scalar_lea.vmem %s169_s7, 12288  ;;  %p2351_p1 = scmp.lt.s32.totalorder %s169_s7, %s169_s7 }
  0x46   : > { %p2344_p13 = scmp.ne.s32.totalorder %s169_s7, %s2343_s24  ;;  %p2352_p4 = scmp.lt.s32.totalorder %s2343_s24, %s2343_s24 }
  0x48   : > { %p2346_p6 = pnand %p2344_p13, %p2502_p8  ;;  %p2353_p7 = por %p2352_p4, %p2351_p1 }
  0x4a   : > { %p2347_p0 = pneg %p2346_p6 }
  0x4c   : > { %p2354_p9 = pnand %p2353_p7, %p2347_p0 }
  0x4e   : > { %2357 = shalt.err (!%p2354_p9)
}
  0x4f   : > { %1966 = dma.hbm_to_vmem [thread:$0]  (!%p2485_p5), %s2727_s2, 12288, %s169_s7, [#allocation7], %s2424_s22, %s2424_s22, %s2425_s29  }
  0x50   : > { %p2737_p3 = scmp.ne.s32.totalorder %s2733_s19, 0 }
  0x51   : > { %p2738_p2 = scmp.ne.s32.totalorder (!%p2737_p3), %s2732_s18, 0 }
  0x52   : > { %184 = sbr.rel (%p2737_p3) target bundleno = 713 (0x2c9), region = 32 }
  0x59   : > { %2397 = dma.done.wait (%p2738_p2), [#allocation4], 1024  }
  0x5a   : > { %2399 = vsyncadd (%p2738_p2), [#allocation4], 4294966272 }
  0x5b   : > { %2401 = dma.done.wait (%p2738_p2), [#allocation7], 24576  }
  0x5c   : > { %2403 = vsyncadd (%p2738_p2), [#allocation7], 4294942720  ;;  %p1714_p8 = scmp.ne.s32.totalorder %s2410_s12, 0 }
  0x5d   : > { %v2010_v0 = vld [vmem:[#allocation3] sm:$0xff] (!%p1714_p8)   ;;  %v2011_v1 = vld [vmem:[#allocation3 + $0x8] sm:$0xff] (!%p1714_p8)   ;;  %v2012_v2 = vld [vmem:[#allocation3 + $0x10] sm:$0xff] (!%p1714_p8)  }
  0x5e   : > { %212 = sbr.rel (%p1714_p8) target bundleno = 101 (0x65), region = 48  ;;  %277 = vst [vmem:[#allocation2] sm:$0xff] (!%p1714_p8), %v2010_v0  ;;  %278 = vst [vmem:[#allocation2 + $0x8] sm:$0xff] (!%p1714_p8), %v2011_v1  ;;  %v2013_v3 = vld [vmem:[#allocation3 + $0x18] sm:$0xff] (!%p1714_p8)   ;;  %v2014_v4 = vld [vmem:[#allocation3 + $0x20] sm:$0xff] (!%p1714_p8)  }
  0x5f   : > { %279 = vst [vmem:[#allocation2 + $0x10] sm:$0xff] (!%p1714_p8), %v2012_v2  ;;  %280 = vst [vmem:[#allocation2 + $0x18] sm:$0xff] (!%p1714_p8), %v2013_v3  ;;  %v2015_v5 = vld [vmem:[#allocation3 + $0x28] sm:$0xff] (!%p1714_p8)   ;;  %v2016_v6 = vld [vmem:[#allocation3 + $0x30] sm:$0xff] (!%p1714_p8)  }
  0x60   : > { %281 = vst [vmem:[#allocation2 + $0x20] sm:$0xff] (!%p1714_p8), %v2014_v4  ;;  %282 = vst [vmem:[#allocation2 + $0x28] sm:$0xff] (!%p1714_p8), %v2015_v5  ;;  %v2017_v7 = vld [vmem:[#allocation3 + $0x38] sm:$0xff] (!%p1714_p8)  }
  0x61   : > { %283 = vst [vmem:[#allocation2 + $0x30] sm:$0xff] (!%p1714_p8), %v2016_v6  ;;  %284 = vst [vmem:[#allocation2 + $0x38] sm:$0xff] (!%p1714_p8), %v2017_v7 }
  0x65 PF: > { %s1811_s18 = sshll.u32 %s2410_s12, 8  ;;  %v2427_v8 = vmov 0   ;;  %v285_v43 = vld [vmem:[#allocation2] sm:$0xff]  ;;  %v286_v51 = vld [vmem:[#allocation2 + $0x8] sm:$0xff]  ;;  %p1790_p5 = scmp.ne.s32.totalorder %s2410_s12, 2 }
  0x66   : > { %520 = vmatprep.mubr.bf16.mxu0 %v2427_v8  ;;  %633 = vmatprep.mubr.bf16.mxu1 %v2427_v8  ;;  %s2579_s19 = scalar_lea.vmem [#allocation6], %s1811_s18  ;;  %s2610_s20 = scalar_lea.vmem [#allocation8], %s1811_s18  ;;  %v287_v61 = vld [vmem:[#allocation2 + $0x10] sm:$0xff]  ;;  %v288_v2 = vld [vmem:[#allocation2 + $0x18] sm:$0xff] }
  0x67   : > { %v2018_v9 = vld [vmem:[%s2579_s19 + $0x4] ss:$16 sps:$4 sm:$0xff]   ;;  %v2020_v10 = vld [vmem:[%s2579_s19 + $0xc] ss:$16 sps:$4 sm:$0xff]   ;;  %v2022_v11 = vld [vmem:[%s2579_s19] ss:$16 sps:$4 sm:$0xff]  }
  0x68   : > { %488 = vmatprep.subr.bf16.mxu0 %v2018_v9  ;;  %v2023_v12 = vld [vmem:[%s2579_s19 + $0x8] ss:$16 sps:$4 sm:$0xff]   ;;  %601 = vmatprep.subr.bf16.mxu1 %v2020_v10  ;;  %v2024_v13 = vld [vmem:[%s2579_s19 + $0x24] ss:$16 sps:$4 sm:$0xff]   ;;  %v2026_v14 = vld [vmem:[%s2579_s19 + $0x2c] ss:$16 sps:$4 sm:$0xff]  }
  0x69   : > { %489 = vmatpush1.bf16.msra.mxu0 %v2022_v11  ;;  %602 = vmatpush1.bf16.msra.mxu1 %v2023_v12  ;;  %v2028_v15 = vld [vmem:[%s2579_s19 + $0x20] ss:$16 sps:$4 sm:$0xff]   ;;  %v2029_v16 = vld [vmem:[%s2579_s19 + $0x28] ss:$16 sps:$4 sm:$0xff]   ;;  %v2030_v17 = vld [vmem:[%s2579_s19 + $0x44] ss:$16 sps:$4 sm:$0xff]  }
  0x6a   : > { %490 = vmatprep.subr.bf16.mxu0 %v2024_v13  ;;  %603 = vmatprep.subr.bf16.mxu1 %v2026_v14  ;;  %v2032_v18 = vld [vmem:[%s2579_s19 + $0x4c] ss:$16 sps:$4 sm:$0xff]   ;;  %v2034_v19 = vld [vmem:[%s2579_s19 + $0x40] ss:$16 sps:$4 sm:$0xff]   ;;  %v2035_v20 = vld [vmem:[%s2579_s19 + $0x48] ss:$16 sps:$4 sm:$0xff]  }
  0x6b   : > { %v2036_v21 = vld [vmem:[%s2579_s19 + $0x64] ss:$16 sps:$4 sm:$0xff]   ;;  %v2038_v22 = vld [vmem:[%s2579_s19 + $0x6c] ss:$16 sps:$4 sm:$0xff]   ;;  %v2040_v23 = vld [vmem:[%s2579_s19 + $0x60] ss:$16 sps:$4 sm:$0xff]  }
  0x6c   : > { %v2041_v24 = vld [vmem:[%s2579_s19 + $0x68] ss:$16 sps:$4 sm:$0xff]   ;;  %v2042_v25 = vld [vmem:[%s2579_s19 + $0x84] ss:$16 sps:$4 sm:$0xff]   ;;  %v2044_v26 = vld [vmem:[%s2579_s19 + $0x8c] ss:$16 sps:$4 sm:$0xff]  }
  0x6d   : > { %491 = vmatpush1.bf16.msra.mxu0 %v2028_v15  ;;  %604 = vmatpush1.bf16.msra.mxu1 %v2029_v16  ;;  %v2046_v27 = vld [vmem:[%s2579_s19 + $0x80] ss:$16 sps:$4 sm:$0xff]   ;;  %v2047_v28 = vld [vmem:[%s2579_s19 + $0x88] ss:$16 sps:$4 sm:$0xff]   ;;  %v2048_v29 = vld [vmem:[%s2579_s19 + $0xa4] ss:$16 sps:$4 sm:$0xff]  }
  0x6e   : > { %492 = vmatprep.subr.bf16.mxu0 %v2030_v17  ;;  %605 = vmatprep.subr.bf16.mxu1 %v2032_v18  ;;  %v2050_v30 = vld [vmem:[%s2579_s19 + $0xac] ss:$16 sps:$4 sm:$0xff]   ;;  %v2052_v31 = vld [vmem:[%s2579_s19 + $0xa0] ss:$16 sps:$4 sm:$0xff]   ;;  %v2053_v32 = vld [vmem:[%s2579_s19 + $0xa8] ss:$16 sps:$4 sm:$0xff]  }
  0x6f   : > { %v2054_v33 = vld [vmem:[%s2579_s19 + $0xc4] ss:$16 sps:$4 sm:$0xff]   ;;  %v2056_v34 = vld [vmem:[%s2579_s19 + $0xcc] ss:$16 sps:$4 sm:$0xff]   ;;  %v2058_v35 = vld [vmem:[%s2579_s19 + $0xc0] ss:$16 sps:$4 sm:$0xff]  }
  0x70   : > { %v2059_v36 = vld [vmem:[%s2579_s19 + $0xc8] ss:$16 sps:$4 sm:$0xff]   ;;  %v2060_v37 = vld [vmem:[%s2579_s19 + $0xe4] ss:$16 sps:$4 sm:$0xff]   ;;  %v2062_v38 = vld [vmem:[%s2579_s19 + $0xec] ss:$16 sps:$4 sm:$0xff]  }
  0x71   : > { %493 = vmatpush1.bf16.msra.mxu0 %v2034_v19  ;;  %606 = vmatpush1.bf16.msra.mxu1 %v2035_v20  ;;  %v2064_v39 = vld [vmem:[%s2579_s19 + $0xe0] ss:$16 sps:$4 sm:$0xff]   ;;  %v2065_v40 = vld [vmem:[%s2579_s19 + $0xe8] ss:$16 sps:$4 sm:$0xff]  }
  0x72   : > { %494 = vmatprep.subr.bf16.mxu0 %v2036_v21  ;;  %607 = vmatprep.subr.bf16.mxu1 %v2038_v22  ;;  %v2066_v41 = vld [vmem:[%s2610_s20 + $0x40] sm:$0xff]   ;;  %v2070_v46 = vld [vmem:[%s2610_s20 + $0x48] sm:$0xff]   ;;  %v2074_v50 = vld [vmem:[%s2610_s20 + $0x50] sm:$0xff]  }
  0x73   : > { %v2067_v42 = vld [vmem:[%s2610_s20 + $0xc0] sm:$0xff]   ;;  %v2071_v47 = vld [vmem:[%s2610_s20 + $0xc8] sm:$0xff]   ;;  %v2075_v52 = vld [vmem:[%s2610_s20 + $0xd0] sm:$0xff]  }
  0x74   : > { %v2068_v44 = vld [vmem:[%s2610_s20] sm:$0xff]   ;;  %v2072_v48 = vld [vmem:[%s2610_s20 + $0x8] sm:$0xff]   ;;  %v2076_v53 = vld [vmem:[%s2610_s20 + $0x10] sm:$0xff]  }
  0x75   : > { %495 = vmatpush1.bf16.msra.mxu0 %v2040_v23  ;;  %608 = vmatpush1.bf16.msra.mxu1 %v2041_v24  ;;  %v2069_v45 = vld [vmem:[%s2610_s20 + $0x80] sm:$0xff]   ;;  %v2073_v49 = vld [vmem:[%s2610_s20 + $0x88] sm:$0xff]   ;;  %v2077_v54 = vld [vmem:[%s2610_s20 + $0x90] sm:$0xff]  }
  0x76   : > { %496 = vmatprep.subr.bf16.mxu0 %v2042_v25  ;;  %609 = vmatprep.subr.bf16.mxu1 %v2044_v26  ;;  %v2078_v55 = vld [vmem:[%s2610_s20 + $0x58] sm:$0xff]   ;;  %v2082_v59 = vld [vmem:[%s2610_s20 + $0x60] sm:$0xff]   ;;  %v2086_v0 = vld [vmem:[%s2610_s20 + $0x68] sm:$0xff]  }
  0x77   : > { %v2079_v56 = vld [vmem:[%s2610_s20 + $0xd8] sm:$0xff]   ;;  %v2083_v60 = vld [vmem:[%s2610_s20 + $0xe0] sm:$0xff]   ;;  %v2087_v1 = vld [vmem:[%s2610_s20 + $0xe8] sm:$0xff]  }
  0x78   : > { %v2080_v57 = vld [vmem:[%s2610_s20 + $0x18] sm:$0xff]   ;;  %v2084_v62 = vld [vmem:[%s2610_s20 + $0x20] sm:$0xff]   ;;  %v290_v4 = vld [vmem:[#allocation2 + $0x28] sm:$0xff] }
  0x79   : > { %497 = vmatpush1.bf16.msra.mxu0 %v2046_v27  ;;  %610 = vmatpush1.bf16.msra.mxu1 %v2047_v28  ;;  %v2081_v58 = vld [vmem:[%s2610_s20 + $0x98] sm:$0xff]   ;;  %v2085_v63 = vld [vmem:[%s2610_s20 + $0xa0] sm:$0xff]   ;;  %v291_v5 = vld [vmem:[#allocation2 + $0x30] sm:$0xff] }
  0x7a   : > { %498 = vmatprep.subr.bf16.mxu0 %v2048_v29  ;;  %611 = vmatprep.subr.bf16.mxu1 %v2050_v30  ;;  %v289_v3 = vld [vmem:[#allocation2 + $0x20] sm:$0xff]  ;;  %v292_v6 = vld [vmem:[#allocation2 + $0x38] sm:$0xff]  ;;  %v2088_v7 = vld [vmem:[%s2610_s20 + $0x28] sm:$0xff]  }
  0x7b   : > { %v2089_v9 = vld [vmem:[%s2610_s20 + $0xa8] sm:$0xff]   ;;  %v2090_v10 = vld [vmem:[%s2610_s20 + $0x70] sm:$0xff]   ;;  %v2095_v14 = vld [vmem:[%s2610_s20 + $0xf8] sm:$0xff]  }
  0x7c   : > { %v2091_v11 = vld [vmem:[%s2610_s20 + $0xf0] sm:$0xff]   ;;  %v2096_v15 = vld [vmem:[%s2610_s20 + $0x38] sm:$0xff]  }
  0x7d   : > { %499 = vmatpush1.bf16.msra.mxu0 %v2052_v31  ;;  %612 = vmatpush1.bf16.msra.mxu1 %v2053_v32  ;;  %v2092_v12 = vld [vmem:[%s2610_s20 + $0x30] sm:$0xff]   ;;  %v2097_v16 = vld [vmem:[%s2610_s20 + $0xb8] sm:$0xff]  }
  0x7e   : > { %500 = vmatprep.subr.bf16.mxu0 %v2054_v33  ;;  %613 = vmatprep.subr.bf16.mxu1 %v2056_v34  ;;  %v2093_v13 = vld [vmem:[%s2610_s20 + $0xb0] sm:$0xff]  }
  0x81   : > { %501 = vmatpush1.bf16.msra.mxu0 %v2058_v35  ;;  %614 = vmatpush1.bf16.msra.mxu1 %v2059_v36 }
  0x82   : > { %502 = vmatprep.subr.bf16.mxu0 %v2060_v37  ;;  %615 = vmatprep.subr.bf16.mxu1 %v2062_v38 }
  0x85   : > { %503 = vmatpush1.bf16.msra.mxu0 %v2064_v39  ;;  %616 = vmatpush1.bf16.msra.mxu1 %v2065_v40 }
  0x86   : > { %1813 = vmatprep.subr.bf16.mxu0 %v2066_v41  ;;  %1877 = vmatprep.subr.bf16.mxu1 %v2067_v42 }
  0x88   : > { %521 = vmatmul.mubr.bf16.vlgmr.msra.gmra.mrb[0].mxu0 %v285_v43  ;;  %634 = vmatmul.mubr.bf16.vlgmr.msra.gmra.mrb[0].mxu1 %v285_v43 }
  0x89   : > { %530 = vmatprep.mubr.bf16.mxu0 %v2427_v8  ;;  %643 = vmatprep.mubr.bf16.mxu1 %v2427_v8 }
  0x8a   : > { %1814 = vmatpush3.bf16.msra.mxu0 %v2068_v44  ;;  %1878 = vmatpush3.bf16.msra.mxu1 %v2069_v45 }
  0x8b   : > { %1815 = vmatprep.subr.bf16.mxu0 %v2070_v46  ;;  %1879 = vmatprep.subr.bf16.mxu1 %v2071_v47 }
  0x8e   : > { %1816 = vmatpush3.bf16.msra.mxu0 %v2072_v48  ;;  %1880 = vmatpush3.bf16.msra.mxu1 %v2073_v49 }
  0x8f   : > { %1817 = vmatprep.subr.bf16.mxu0 %v2074_v50  ;;  %1881 = vmatprep.subr.bf16.mxu1 %v2075_v52 }
  0x90   : > { %531 = vmatmul.mubr.bf16.gmra.mrb[4].mxu0 %v286_v51  ;;  %644 = vmatmul.mubr.bf16.gmra.mrb[4].mxu1 %v286_v51 }
  0x91   : > { %540 = vmatprep.mubr.bf16.mxu0 %v2427_v8  ;;  %653 = vmatprep.mubr.bf16.mxu1 %v2427_v8 }
  0x92   : > { %1818 = vmatpush3.bf16.msra.mxu0 %v2076_v53  ;;  %1882 = vmatpush3.bf16.msra.mxu1 %v2077_v54 }
  0x93   : > { %1819 = vmatprep.subr.bf16.mxu0 %v2078_v55  ;;  %1883 = vmatprep.subr.bf16.mxu1 %v2079_v56 }
  0x96   : > { %1820 = vmatpush3.bf16.msra.mxu0 %v2080_v57  ;;  %1884 = vmatpush3.bf16.msra.mxu1 %v2081_v58 }
  0x97   : > { %1821 = vmatprep.subr.bf16.mxu0 %v2082_v59  ;;  %1885 = vmatprep.subr.bf16.mxu1 %v2083_v60 }
  0x98   : > { %541 = vmatmul.mubr.bf16.gmra.mrb[8].mxu0 %v287_v61  ;;  %654 = vmatmul.mubr.bf16.gmra.mrb[8].mxu1 %v287_v61 }
  0x99   : > { %550 = vmatprep.mubr.bf16.mxu0 %v2427_v8  ;;  %663 = vmatprep.mubr.bf16.mxu1 %v2427_v8 }
  0x9a   : > { %1822 = vmatpush3.bf16.msra.mxu0 %v2084_v62  ;;  %1886 = vmatpush3.bf16.msra.mxu1 %v2085_v63 }
  0x9b   : > { %1823 = vmatprep.subr.bf16.mxu0 %v2086_v0  ;;  %1887 = vmatprep.subr.bf16.mxu1 %v2087_v1 }
  0x9e   : > { %1824 = vmatpush3.bf16.msra.mxu0 %v2088_v7  ;;  %1888 = vmatpush3.bf16.msra.mxu1 %v2089_v9 }
  0x9f   : > { %1825 = vmatprep.subr.bf16.mxu0 %v2090_v10  ;;  %1889 = vmatprep.subr.bf16.mxu1 %v2091_v11 }
  0xa0   : > { %551 = vmatmul.mubr.bf16.gmra.mrb[12].mxu0 %v288_v2  ;;  %664 = vmatmul.mubr.bf16.gmra.mrb[12].mxu1 %v288_v2 }
  0xa1   : > { %560 = vmatprep.mubr.bf16.mxu0 %v2427_v8  ;;  %673 = vmatprep.mubr.bf16.mxu1 %v2427_v8 }
  0xa2   : > { %1826 = vmatpush3.bf16.msra.mxu0 %v2092_v12  ;;  %1890 = vmatpush3.bf16.msra.mxu1 %v2093_v13 }
  0xa3   : > { %1891 = vmatprep.subr.bf16.mxu1 %v2095_v14 }
  0xa6   : > { %1892 = vmatpush3.bf16.msra.mxu1 %v2097_v16 }
  0xa8   : > { %561 = vmatmul.mubr.bf16.gmra.mrb[16].mxu0 %v289_v3  ;;  %674 = vmatmul.mubr.bf16.gmra.mrb[16].mxu1 %v289_v3 }
  0xa9   : > { %570 = vmatprep.mubr.bf16.mxu0 %v2427_v8  ;;  %683 = vmatprep.mubr.bf16.mxu1 %v2427_v8 }
  0xb0   : > { %571 = vmatmul.mubr.bf16.gmra.mrb[20].mxu0 %v290_v4  ;;  %684 = vmatmul.mubr.bf16.gmra.mrb[20].mxu1 %v290_v4 }
  0xb1   : > { %580 = vmatprep.mubr.bf16.mxu0 %v2427_v8  ;;  %693 = vmatprep.mubr.bf16.mxu1 %v2427_v8 }
  0xb8   : > { %581 = vmatmul.mubr.bf16.gmra.mrb[24].mxu0 %v291_v5  ;;  %694 = vmatmul.mubr.bf16.gmra.mrb[24].mxu1 %v291_v5 }
  0xb9   : > { %590 = vmatprep.mubr.bf16.mxu0 %v2427_v8  ;;  %703 = vmatprep.mubr.bf16.mxu1 %v2427_v8  ;;  %v2094_v8 = vld [vmem:[%s2610_s20 + $0x78] sm:$0xff]  }
  0xba   : > { %1827 = vmatprep.subr.bf16.mxu0 %v2094_v8 }
  0xbb   : > { %1828 = vmatpush3.bf16.msra.mxu0 %v2096_v15 }
  0xc0   : > { %591 = vmatmul.mubr.bf16.gmra.mrb[28].mxu0 %v292_v6  ;;  %704 = vmatmul.mubr.bf16.gmra.mrb[28].mxu1 %v292_v6 }
 0x15b   : > { %v522_v17 = vpop.f32.mrb[0].mxu0  ;;  %v635_v18 = vpop.f32.mrb[0].mxu1 }
 0x15c   : > { %v714_v19 = vmul.f32 0.5, %v522_v17  ;;  %v716_v20 = vmul.f32 0.5, %v635_v18  ;;  %v524_v21 = vpop.f32.mrb[1].mxu0  ;;  %v637_v22 = vpop.f32.mrb[1].mxu1 }
 0x15d   : > { %v715_v23 = vmul.f32 0.5, %v524_v21  ;;  %v717_v24 = vmul.f32 0.5, %v637_v22  ;;  %v526_v25 = vpop.f32.mrb[2].mxu0  ;;  %v639_v26 = vpop.f32.mrb[2].mxu1 }
 0x15e   : > { %2098 = vtanh.f32 %v714_v19  ;;  %v718_v27 = vmul.f32 0.5, %v526_v25  ;;  %v528_v28 = vpop.f32.mrb[3].mxu0  ;;  %v641_v29 = vpop.f32.mrb[3].mxu1  ;;  %v720_v30 = vmul.f32 0.5, %v639_v26 }
 0x15f   : > { %2100 = vtanh.f32 %v716_v20  ;;  %v719_v31 = vmul.f32 0.5, %v528_v28  ;;  %v721_v32 = vmul.f32 0.5, %v641_v29 }
 0x160   : > { %2102 = vtanh.f32 %v715_v23 }
 0x161   : > { %2104 = vtanh.f32 %v717_v24 }
 0x162   : > { %2106 = vtanh.f32 %v718_v27 }
 0x163   : > { %2108 = vtanh.f32 %v720_v30  ;;  %v532_v33 = vpop.f32.mrb[4].mxu0  ;;  %v645_v34 = vpop.f32.mrb[4].mxu1 }
 0x164   : > { %2110 = vtanh.f32 %v719_v31  ;;  %v722_v35 = vmul.f32 0.5, %v532_v33  ;;  %v724_v36 = vmul.f32 0.5, %v645_v34  ;;  %v534_v37 = vpop.f32.mrb[5].mxu0  ;;  %v647_v38 = vpop.f32.mrb[5].mxu1 }
 0x165   : > { %2112 = vtanh.f32 %v721_v32  ;;  %v723_v39 = vmul.f32 0.5, %v534_v37  ;;  %v725_v40 = vmul.f32 0.5, %v647_v38  ;;  %v536_v41 = vpop.f32.mrb[6].mxu0  ;;  %v649_v42 = vpop.f32.mrb[6].mxu1 }
 0x166   : > { %2114 = vtanh.f32 %v722_v35  ;;  %v726_v43 = vmul.f32 0.5, %v536_v41  ;;  %v538_v44 = vpop.f32.mrb[7].mxu0  ;;  %v651_v45 = vpop.f32.mrb[7].mxu1  ;;  %v728_v46 = vmul.f32 0.5, %v649_v42 }
 0x167   : > { %2116 = vtanh.f32 %v724_v36  ;;  %v727_v48 = vmul.f32 0.5, %v538_v44  ;;  %v729_v51 = vmul.f32 0.5, %v651_v45 }
 0x168   : > { %v2099_v47 = vpop.eup %2098  ;;  %2118 = vtanh.f32 %v723_v39 }
 0x169   : > { %v2101_v49 = vpop.eup %2100  ;;  %v842_v50 = vmul.f32 0.5, %v2099_v47  ;;  %2120 = vtanh.f32 %v725_v40 }
 0x16a   : > { %v2103_v52 = vpop.eup %2102  ;;  %v844_v53 = vmul.f32 0.5, %v2101_v49  ;;  %2122 = vtanh.f32 %v726_v43 }
 0x16b   : > { %v2105_v54 = vpop.eup %2104  ;;  %2124 = vtanh.f32 %v728_v46  ;;  %v542_v55 = vpop.f32.mrb[8].mxu0  ;;  %v2663_v58 = vadd.f32 0.5, %v842_v50  ;;  %v843_v59 = vmul.f32 0.5, %v2103_v52 }
 0x16c   : > { %v655_v56 = vpop.f32.mrb[8].mxu1  ;;  %v2107_v57 = vpop.eup %2106  ;;  %2126 = vtanh.f32 %v727_v48  ;;  %v730_v60 = vmul.f32 0.5, %v542_v55  ;;  %v2665_v0 = vadd.f32 0.5, %v844_v53  ;;  %v845_v6 = vmul.f32 0.5, %v2105_v54 }
 0x16d   : > { %v544_v61 = vpop.f32.mrb[9].mxu0  ;;  %v657_v62 = vpop.f32.mrb[9].mxu1  ;;  %v846_v1 = vmul.f32 0.5, %v2107_v57  ;;  %2128 = vtanh.f32 %v729_v51  ;;  %v732_v2 = vmul.f32 0.5, %v655_v56  ;;  %v907_v24 = vadd.f32 0.5, %v843_v59 }
 0x16e   : > { %v2109_v63 = vpop.eup %2108  ;;  %v546_v3 = vpop.f32.mrb[10].mxu0  ;;  %2130 = vtanh.f32 %v730_v60  ;;  %v731_v9 = vmul.f32 0.5, %v544_v61  ;;  %v733_v14 = vmul.f32 0.5, %v657_v62  ;;  %v909_v29 = vadd.f32 0.5, %v845_v6 }
 0x16f   : > { %v659_v4 = vpop.f32.mrb[10].mxu1  ;;  %v2111_v5 = vpop.eup %2110  ;;  %v848_v7 = vmul.f32 0.5, %v2109_v63  ;;  %v910_v13 = vadd.f32 0.5, %v846_v1  ;;  %2132 = vtanh.f32 %v732_v2  ;;  %v734_v18 = vmul.f32 0.5, %v546_v3 }
 0x170   : > { %v548_v10 = vpop.f32.mrb[11].mxu0  ;;  %v661_v11 = vpop.f32.mrb[11].mxu1  ;;  %v847_v8 = vmul.f32 0.5, %v2111_v5  ;;  %2134 = vtanh.f32 %v731_v9  ;;  %v736_v30 = vmul.f32 0.5, %v659_v4 }
 0x171   : > { %v2113_v12 = vpop.eup %2112  ;;  %v912_v16 = vadd.f32 0.5, %v848_v7  ;;  %v970_v20 = vpack.c.bf16 %v910_v13, %v2663_v58  ;;  %2136 = vtanh.f32 %v733_v14  ;;  %v735_v31 = vmul.f32 0.5, %v548_v10 }
 0x172   : > { %v2115_v15 = vpop.eup %2114  ;;  %v849_v17 = vmul.f32 0.5, %v2113_v12  ;;  %v911_v21 = vadd.f32 0.5, %v847_v8  ;;  %2138 = vtanh.f32 %v734_v18  ;;  %v737_v35 = vmul.f32 0.5, %v661_v11 }
 0x173   : > { %v2117_v19 = vpop.eup %2116  ;;  %v850_v22 = vmul.f32 0.5, %v2115_v15  ;;  %v972_v25 = vpack.c.bf16 %v912_v16, %v2665_v0  ;;  %v552_v32 = vpop.f32.mrb[12].mxu0  ;;  %2140 = vtanh.f32 %v736_v30 }
 0x174   : > { %v2119_v23 = vpop.eup %2118  ;;  %v913_v26 = vadd.f32 0.5, %v849_v17  ;;  %v852_v27 = vmul.f32 0.5, %v2117_v19  ;;  %v665_v33 = vpop.f32.mrb[12].mxu1  ;;  %v971_v36 = vpack.c.bf16 %v911_v21, %v907_v24  ;;  %2142 = vtanh.f32 %v735_v31 }
 0x175   : > { %v2121_v28 = vpop.eup %2120  ;;  %v554_v37 = vpop.f32.mrb[13].mxu0  ;;  %v2669_v40 = vadd.f32 0.5, %v850_v22  ;;  %v851_v41 = vmul.f32 0.5, %v2119_v23  ;;  %v738_v48 = vmul.f32 0.5, %v552_v32  ;;  %2144 = vtanh.f32 %v737_v35 }
 0x176   : > { %v2123_v34 = vpop.eup %2122  ;;  %v667_v38 = vpop.f32.mrb[13].mxu1  ;;  %v973_v42 = vpack.c.bf16 %v913_v26, %v909_v29  ;;  %v2671_v46 = vadd.f32 0.5, %v852_v27  ;;  %v853_v47 = vmul.f32 0.5, %v2121_v28  ;;  %1292 = vmatprep.mubr.bf16.mxu0 %v971_v36  ;;  %v740_v54 = vmul.f32 0.5, %v665_v33 }
 0x177   : > { %v2125_v39 = vpop.eup %2124  ;;  %v556_v43 = vpop.f32.mrb[14].mxu0  ;;  %v854_v52 = vmul.f32 0.5, %v2123_v34  ;;  %1293 = vmatmul.mubr.bf16.vlgmr.msra.gmra.mrb[32].mxu0 %v970_v20  ;;  %2146 = vtanh.f32 %v738_v48  ;;  %v739_v58 = vmul.f32 0.5, %v554_v37  ;;  %v915_v60 = vadd.f32 0.5, %v851_v41 }
 0x178   : > { %v669_v44 = vpop.f32.mrb[14].mxu1  ;;  %v2127_v45 = vpop.eup %2126  ;;  %1389 = vmatprep.mubr.bf16.mxu1 %v973_v42  ;;  %v856_v56 = vmul.f32 0.5, %v2125_v39  ;;  %2148 = vtanh.f32 %v740_v54  ;;  %v741_v62 = vmul.f32 0.5, %v667_v38  ;;  %v742_v2 = vmul.f32 0.5, %v556_v43 }
 0x179   : > { %v558_v49 = vpop.f32.mrb[15].mxu0  ;;  %v671_v50 = vpop.f32.mrb[15].mxu1  ;;  %v855_v53 = vmul.f32 0.5, %v2127_v45  ;;  %1390 = vmatmul.mubr.bf16.vlgmr.msra.gmra.mrb[32].mxu1 %v972_v25  ;;  %2150 = vtanh.f32 %v739_v58  ;;  %v917_v4 = vadd.f32 0.5, %v853_v47  ;;  %v744_v6 = vmul.f32 0.5, %v669_v44 }
 0x17a   : > { %v2129_v51 = vpop.eup %2128  ;;  %2152 = vtanh.f32 %v741_v62  ;;  %v918_v10 = vadd.f32 0.5, %v854_v52  ;;  %v920_v11 = vadd.f32 0.5, %v856_v56  ;;  %v743_v12 = vmul.f32 0.5, %v558_v49 }
 0x17b   : > { %v2131_v55 = vpop.eup %2130  ;;  %v857_v57 = vmul.f32 0.5, %v2129_v51  ;;  %v919_v0 = vadd.f32 0.5, %v855_v53  ;;  %v562_v7 = vpop.f32.mrb[16].mxu0  ;;  %2154 = vtanh.f32 %v742_v2  ;;  %v745_v17 = vmul.f32 0.5, %v671_v50 }
 0x17c   : > { %v2133_v59 = vpop.eup %2132  ;;  %v858_v61 = vmul.f32 0.5, %v2131_v55  ;;  %v675_v9 = vpop.f32.mrb[16].mxu1  ;;  %2156 = vtanh.f32 %v744_v6  ;;  %v746_v27 = vmul.f32 0.5, %v562_v7  ;;  %v974_v31 = vpack.c.bf16 %v918_v10, %v2669_v40 }
 0x17d   : > { %v2135_v63 = vpop.eup %2134  ;;  %v921_v1 = vadd.f32 0.5, %v857_v57  ;;  %v564_v13 = vpop.f32.mrb[17].mxu0  ;;  %v2675_v16 = vmul.f32 0.5, %v2133_v59  ;;  %2158 = vtanh.f32 %v743_v12  ;;  %v975_v21 = vpack.c.bf16 %v919_v0, %v915_v60 }
 0x17e   : > { %v2137_v3 = vpop.eup %2136  ;;  %v859_v5 = vmul.f32 0.5, %v2135_v63  ;;  %v677_v8 = vpop.f32.mrb[17].mxu1  ;;  %v2673_v15 = vadd.f32 0.5, %v858_v61  ;;  %2160 = vtanh.f32 %v745_v17  ;;  %v748_v28 = vmul.f32 0.5, %v675_v9 }
 0x17f   : > { %v2139_v14 = vpop.eup %2138  ;;  %v566_v18 = vpop.f32.mrb[18].mxu0  ;;  %v861_v20 = vmul.f32 0.5, %v2137_v3  ;;  %v977_v22 = vpack.c.bf16 %v921_v1, %v917_v4  ;;  %1300 = vmatprep.mubr.bf16.mxu0 %v975_v21  ;;  %v976_v32 = vpack.c.bf16 %v920_v11, %v2671_v46  ;;  %v747_v33 = vmul.f32 0.5, %v564_v13 }
 0x180   : > { %v679_v19 = vpop.f32.mrb[18].mxu1  ;;  %v568_v23 = vpop.f32.mrb[19].mxu0  ;;  %v923_v26 = vadd.f32 0.5, %v859_v5  ;;  %v862_v30 = vmul.f32 0.5, %v2139_v14  ;;  %2162 = vtanh.f32 %v746_v27  ;;  %v749_v36 = vmul.f32 0.5, %v677_v8  ;;  %1301 = vmatmul.mubr.bf16.gmra.mrb[36].mxu0 %v974_v31 }
 0x181   : > { %v681_v24 = vpop.f32.mrb[19].mxu1  ;;  %v2141_v25 = vpop.eup %2140  ;;  %1397 = vmatprep.mubr.bf16.mxu1 %v977_v22  ;;  %v750_v37 = vmul.f32 0.5, %v566_v18  ;;  %2164 = vtanh.f32 %v748_v28  ;;  %v752_v42 = vmul.f32 0.5, %v679_v19  ;;  %v925_v44 = vadd.f32 0.5, %v861_v20 }
 0x182   : > { %v2143_v29 = vpop.eup %2142  ;;  %v864_v39 = vmul.f32 0.5, %v2141_v25  ;;  %1398 = vmatmul.mubr.bf16.gmra.mrb[36].mxu1 %v976_v32  ;;  %2166 = vtanh.f32 %v747_v33  ;;  %v751_v40 = vmul.f32 0.5, %v568_v23  ;;  %v753_v51 = vmul.f32 0.5, %v681_v24 }
 0x183   : > { %v2145_v34 = vpop.eup %2144  ;;  %v863_v35 = vmul.f32 0.5, %v2143_v29  ;;  %v572_v47 = vpop.f32.mrb[20].mxu0  ;;  %2168 = vtanh.f32 %v749_v36  ;;  %v926_v55 = vadd.f32 0.5, %v862_v30  ;;  %v924_v3 = vadd.f32 0.5, %v2675_v16 }
 0x184   : > { %v2147_v38 = vpop.eup %2146  ;;  %v865_v41 = vmul.f32 0.5, %v2145_v34  ;;  %v685_v46 = vpop.f32.mrb[20].mxu1  ;;  %2170 = vtanh.f32 %v750_v37  ;;  %v928_v61 = vadd.f32 0.5, %v864_v39  ;;  %v754_v5 = vmul.f32 0.5, %v572_v47 }
 0x185   : > { %v2149_v43 = vpop.eup %2148  ;;  %v927_v45 = vadd.f32 0.5, %v863_v35  ;;  %v866_v50 = vmul.f32 0.5, %v2147_v38  ;;  %v574_v52 = vpop.f32.mrb[21].mxu0  ;;  %2172 = vtanh.f32 %v752_v42  ;;  %v756_v10 = vmul.f32 0.5, %v685_v46 }
 0x186   : > { %v2151_v48 = vpop.eup %2150  ;;  %v929_v49 = vadd.f32 0.5, %v865_v41  ;;  %v687_v53 = vpop.f32.mrb[21].mxu1  ;;  %v868_v4 = vmul.f32 0.5, %v2149_v43  ;;  %2174 = vtanh.f32 %v751_v40  ;;  %v978_v14 = vpack.c.bf16 %v926_v55, %v2673_v15 }
 0x187   : > { %v2153_v54 = vpop.eup %2152  ;;  %v867_v56 = vmul.f32 0.5, %v2151_v48  ;;  %v979_v57 = vpack.c.bf16 %v927_v45, %v923_v26  ;;  %v576_v58 = vpop.f32.mrb[22].mxu0  ;;  %v2680_v7 = vadd.f32 0.5, %v866_v50  ;;  %2176 = vtanh.f32 %v753_v51 }
 0x188   : > { %v689_v59 = vpop.f32.mrb[22].mxu1  ;;  %v2155_v60 = vpop.eup %2154  ;;  %v869_v62 = vmul.f32 0.5, %v2153_v54  ;;  %v981_v63 = vpack.c.bf16 %v929_v49, %v925_v44  ;;  %2178 = vtanh.f32 %v754_v5  ;;  %v980_v16 = vpack.c.bf16 %v928_v61, %v924_v3 }
 0x189   : > { %v578_v0 = vpop.f32.mrb[23].mxu0  ;;  %v691_v1 = vpop.f32.mrb[23].mxu1  ;;  %1308 = vmatprep.mubr.bf16.mxu0 %v979_v57  ;;  %v870_v9 = vmul.f32 0.5, %v2155_v60  ;;  %v931_v12 = vadd.f32 0.5, %v867_v56  ;;  %v755_v21 = vmul.f32 0.5, %v574_v52  ;;  %v757_v22 = vmul.f32 0.5, %v687_v53 }
 0x18a   : > { %v2157_v2 = vpop.eup %2156  ;;  %1405 = vmatprep.mubr.bf16.mxu1 %v981_v63  ;;  %v933_v13 = vadd.f32 0.5, %v869_v62  ;;  %1309 = vmatmul.mubr.bf16.gmra.mrb[40].mxu0 %v978_v14  ;;  %v758_v23 = vmul.f32 0.5, %v576_v58  ;;  %2180 = vtanh.f32 %v756_v10  ;;  %v760_v29 = vmul.f32 0.5, %v689_v59 }
 0x18b   : > { %v2159_v6 = vpop.eup %2158  ;;  %v872_v17 = vmul.f32 0.5, %v2157_v2  ;;  %v582_v24 = vpop.f32.mrb[24].mxu0  ;;  %v934_v27 = vadd.f32 0.5, %v870_v9  ;;  %1406 = vmatmul.mubr.bf16.gmra.mrb[40].mxu1 %v980_v16  ;;  %2182 = vtanh.f32 %v755_v21  ;;  %v759_v33 = vmul.f32 0.5, %v578_v0 }
 0x18c   : > { %v2161_v11 = vpop.eup %2160  ;;  %v871_v8 = vmul.f32 0.5, %v2159_v6  ;;  %v695_v25 = vpop.f32.mrb[24].mxu1  ;;  %2184 = vtanh.f32 %v757_v22  ;;  %v761_v39 = vmul.f32 0.5, %v691_v1  ;;  %v932_v45 = vadd.f32 0.5, %v868_v4 }
 0x18d   : > { %v873_v18 = vmul.f32 0.5, %v2161_v11  ;;  %v2163_v19 = vpop.eup %2162  ;;  %v584_v30 = vpop.f32.mrb[25].mxu0  ;;  %v936_v38 = vadd.f32 0.5, %v872_v17  ;;  %2186 = vtanh.f32 %v758_v23  ;;  %v762_v47 = vmul.f32 0.5, %v582_v24 }
 0x18e   : > { %v935_v20 = vadd.f32 0.5, %v871_v8  ;;  %v2165_v26 = vpop.eup %2164  ;;  %v697_v15 = vpop.f32.mrb[25].mxu1  ;;  %v874_v32 = vmul.f32 0.5, %v2163_v19  ;;  %2188 = vtanh.f32 %v760_v29  ;;  %v764_v50 = vmul.f32 0.5, %v695_v25 }
 0x18f   : > { %v937_v28 = vadd.f32 0.5, %v873_v18  ;;  %v2167_v31 = vpop.eup %2166  ;;  %v586_v35 = vpop.f32.mrb[26].mxu0  ;;  %v876_v48 = vmul.f32 0.5, %v2165_v26  ;;  %2190 = vtanh.f32 %v759_v33  ;;  %v982_v54 = vpack.c.bf16 %v934_v27, %v2680_v7 }
 0x190   : > { %v983_v34 = vpack.c.bf16 %v935_v20, %v931_v12  ;;  %v699_v36 = vpop.f32.mrb[26].mxu1  ;;  %v2169_v37 = vpop.eup %2168  ;;  %v875_v40 = vmul.f32 0.5, %v2167_v31  ;;  %v2683_v52 = vadd.f32 0.5, %v874_v32  ;;  %2192 = vtanh.f32 %v761_v39 }
 0x191   : > { %v985_v41 = vpack.c.bf16 %v937_v28, %v933_v13  ;;  %v588_v42 = vpop.f32.mrb[27].mxu0  ;;  %v701_v43 = vpop.f32.mrb[27].mxu1  ;;  %v877_v49 = vmul.f32 0.5, %v2169_v37  ;;  %v984_v58 = vpack.c.bf16 %v936_v38, %v932_v45  ;;  %2194 = vtanh.f32 %v762_v47 }
 0x192   : > { %v2171_v44 = vpop.eup %2170  ;;  %1316 = vmatprep.mubr.bf16.mxu0 %v983_v34  ;;  %v939_v59 = vadd.f32 0.5, %v875_v40  ;;  %v763_v61 = vmul.f32 0.5, %v584_v30  ;;  %2196 = vtanh.f32 %v764_v50  ;;  %v765_v3 = vmul.f32 0.5, %v697_v15 }
 0x193   : > { %v2173_v46 = vpop.eup %2172  ;;  %1413 = vmatprep.mubr.bf16.mxu1 %v985_v41  ;;  %v878_v53 = vmul.f32 0.5, %v2171_v44  ;;  %1317 = vmatmul.mubr.bf16.gmra.mrb[44].mxu0 %v982_v54  ;;  %v592_v62 = vpop.f32.mrb[28].mxu0  ;;  %v941_v1 = vadd.f32 0.5, %v877_v49  ;;  %v766_v9 = vmul.f32 0.5, %v586_v35  ;;  %v768_v8 = vmul.f32 0.5, %v699_v36 }
 0x194   : > { %v2175_v51 = vpop.eup %2174  ;;  %v880_v56 = vmul.f32 0.5, %v2173_v46  ;;  %v705_v63 = vpop.f32.mrb[28].mxu1  ;;  %1414 = vmatmul.mubr.bf16.gmra.mrb[44].mxu1 %v984_v58  ;;  %2198 = vtanh.f32 %v763_v61  ;;  %v767_v14 = vmul.f32 0.5, %v588_v42  ;;  %v769_v20 = vmul.f32 0.5, %v701_v43 }
 0x195   : > { %v2177_v55 = vpop.eup %2176  ;;  %v879_v57 = vmul.f32 0.5, %v2175_v51  ;;  %v594_v4 = vpop.f32.mrb[29].mxu0  ;;  %v942_v6 = vadd.f32 0.5, %v878_v53  ;;  %2200 = vtanh.f32 %v765_v3  ;;  %v940_v23 = vadd.f32 0.5, %v876_v48 }
 0x196   : > { %v881_v60 = vmul.f32 0.5, %v2177_v55  ;;  %v2179_v0 = vpop.eup %2178  ;;  %v707_v5 = vpop.f32.mrb[29].mxu1  ;;  %v944_v13 = vadd.f32 0.5, %v880_v56  ;;  %2202 = vtanh.f32 %v766_v9  ;;  %v770_v25 = vmul.f32 0.5, %v592_v62 }
 0x197   : > { %v943_v2 = vadd.f32 0.5, %v879_v57  ;;  %v596_v10 = vpop.f32.mrb[30].mxu0  ;;  %v709_v11 = vpop.f32.mrb[30].mxu1  ;;  %v882_v19 = vmul.f32 0.5, %v2179_v0  ;;  %2204 = vtanh.f32 %v768_v8  ;;  %v772_v28 = vmul.f32 0.5, %v705_v63 }
 0x198   : > { %v945_v7 = vadd.f32 0.5, %v881_v60  ;;  %v2181_v12 = vpop.eup %2180  ;;  %v598_v17 = vpop.f32.mrb[31].mxu0  ;;  %2206 = vtanh.f32 %v767_v14  ;;  %v986_v29 = vpack.c.bf16 %v942_v6, %v2683_v52  ;;  %v988_v32 = vpack.c.bf16 %v944_v13, %v940_v23 }
 0x199   : > { %v711_v18 = vpop.f32.mrb[31].mxu1  ;;  %v2183_v16 = vpop.eup %2182  ;;  %v987_v21 = vpack.c.bf16 %v943_v2, %v939_v59  ;;  %v884_v15 = vmul.f32 0.5, %v2181_v12  ;;  %2208 = vtanh.f32 %v769_v20  ;;  %v946_v34 = vadd.f32 0.5, %v882_v19 }
 0x19a   : > { %v2185_v22 = vpop.eup %2184  ;;  %v989_v24 = vpack.c.bf16 %v945_v7, %v941_v1  ;;  %v883_v27 = vmul.f32 0.5, %v2183_v16  ;;  %2210 = vtanh.f32 %v770_v25  ;;  %v771_v36 = vmul.f32 0.5, %v594_v4 }
 0x19b   : > { %v2187_v26 = vpop.eup %2186  ;;  %1324 = vmatprep.mubr.bf16.mxu0 %v987_v21  ;;  %v885_v38 = vmul.f32 0.5, %v2185_v22  ;;  %2212 = vtanh.f32 %v772_v28  ;;  %v773_v41 = vmul.f32 0.5, %v707_v5  ;;  %v774_v45 = vmul.f32 0.5, %v596_v10 }
 0x19c   : > { %v2189_v30 = vpop.eup %2188  ;;  %v886_v31 = vmul.f32 0.5, %v2187_v26  ;;  %1421 = vmatprep.mubr.bf16.mxu1 %v989_v24  ;;  %1325 = vmatmul.mubr.bf16.gmra.mrb[48].mxu0 %v986_v29  ;;  %v947_v43 = vadd.f32 0.5, %v883_v27  ;;  %2214 = vtanh.f32 %v771_v36  ;;  %v776_v48 = vmul.f32 0.5, %v709_v11 }
 0x19d   : > { %v2191_v33 = vpop.eup %2190  ;;  %v888_v35 = vmul.f32 0.5, %v2189_v30  ;;  %1422 = vmatmul.mubr.bf16.gmra.mrb[48].mxu1 %v988_v32  ;;  %2216 = vtanh.f32 %v773_v41  ;;  %v775_v52 = vmul.f32 0.5, %v598_v17  ;;  %v949_v54 = vadd.f32 0.5, %v885_v38 }
 0x19e   : > { %v2193_v37 = vpop.eup %2192  ;;  %v887_v39 = vmul.f32 0.5, %v2191_v33  ;;  %v950_v47 = vadd.f32 0.5, %v886_v31  ;;  %2218 = vtanh.f32 %v774_v45  ;;  %v777_v56 = vmul.f32 0.5, %v711_v18 }
 0x19f   : > { %v2195_v42 = vpop.eup %2194  ;;  %v889_v44 = vmul.f32 0.5, %v2193_v37  ;;  %v952_v50 = vadd.f32 0.5, %v888_v35  ;;  %2220 = vtanh.f32 %v776_v48  ;;  %v948_v58 = vadd.f32 0.5, %v884_v15 }
 0x1a0   : > { %v2197_v40 = vpop.eup %2196  ;;  %v951_v46 = vadd.f32 0.5, %v887_v39  ;;  %v890_v55 = vmul.f32 0.5, %v2195_v42  ;;  %2222 = vtanh.f32 %v775_v52  ;;  %v990_v4 = vpack.c.bf16 %v950_v47, %v946_v34 }
 0x1a1   : > { %v2199_v49 = vpop.eup %2198  ;;  %v953_v51 = vadd.f32 0.5, %v889_v44  ;;  %v892_v59 = vmul.f32 0.5, %v2197_v40  ;;  %2224 = vtanh.f32 %v777_v56  ;;  %v992_v5 = vpack.c.bf16 %v952_v50, %v948_v58 }
 0x1a2   : > { %v2201_v53 = vpop.eup %2200  ;;  %v991_v60 = vpack.c.bf16 %v951_v46, %v947_v43  ;;  %v891_v62 = vmul.f32 0.5, %v2199_v49  ;;  %v954_v7 = vadd.f32 0.5, %v890_v55 }
 0x1a3   : > { %v2203_v57 = vpop.eup %2202  ;;  %v993_v0 = vpack.c.bf16 %v953_v51, %v949_v54  ;;  %v893_v2 = vmul.f32 0.5, %v2201_v53  ;;  %v956_v12 = vadd.f32 0.5, %v892_v59 }
 0x1a4   : > { %v2205_v61 = vpop.eup %2204  ;;  %v894_v63 = vmul.f32 0.5, %v2203_v57  ;;  %1332 = vmatprep.mubr.bf16.mxu0 %v991_v60  ;;  %v955_v17 = vadd.f32 0.5, %v891_v62 }
 0x1a5   : > { %v2207_v1 = vpop.eup %2206  ;;  %v896_v3 = vmul.f32 0.5, %v2205_v61  ;;  %1429 = vmatprep.mubr.bf16.mxu1 %v993_v0  ;;  %1333 = vmatmul.mubr.bf16.gmra.mrb[52].mxu0 %v990_v4  ;;  %v957_v20 = vadd.f32 0.5, %v893_v2 }
 0x1a6   : > { %v2209_v6 = vpop.eup %2208  ;;  %v958_v9 = vadd.f32 0.5, %v894_v63  ;;  %v895_v10 = vmul.f32 0.5, %v2207_v1  ;;  %1430 = vmatmul.mubr.bf16.gmra.mrb[52].mxu1 %v992_v5 }
 0x1a7   : > { %v2211_v11 = vpop.eup %2210  ;;  %v960_v13 = vadd.f32 0.5, %v896_v3  ;;  %v897_v8 = vmul.f32 0.5, %v2209_v6 }
 0x1a8   : > { %v2213_v14 = vpop.eup %2212  ;;  %v959_v18 = vadd.f32 0.5, %v895_v10  ;;  %v994_v16 = vpack.c.bf16 %v958_v9, %v954_v7  ;;  %v898_v24 = vmul.f32 0.5, %v2211_v11 }
 0x1a9   : > { %v2215_v19 = vpop.eup %2214  ;;  %v961_v21 = vadd.f32 0.5, %v897_v8  ;;  %v996_v22 = vpack.c.bf16 %v960_v13, %v956_v12  ;;  %v900_v27 = vmul.f32 0.5, %v2213_v14 }
 0x1aa   : > { %v2217_v23 = vpop.eup %2216  ;;  %v995_v25 = vpack.c.bf16 %v959_v18, %v955_v17  ;;  %v899_v30 = vmul.f32 0.5, %v2215_v19  ;;  %v962_v35 = vadd.f32 0.5, %v898_v24 }
 0x1ab   : > { %v2219_v26 = vpop.eup %2218  ;;  %v997_v28 = vpack.c.bf16 %v961_v21, %v957_v20  ;;  %v901_v32 = vmul.f32 0.5, %v2217_v23  ;;  %v964_v38 = vadd.f32 0.5, %v900_v27 }
 0x1ac   : > { %v2221_v29 = vpop.eup %2220  ;;  %v902_v15 = vmul.f32 0.5, %v2219_v26  ;;  %1340 = vmatprep.mubr.bf16.mxu0 %v995_v25  ;;  %v963_v42 = vadd.f32 0.5, %v899_v30 }
 0x1ad   : > { %v2223_v31 = vpop.eup %2222  ;;  %v904_v33 = vmul.f32 0.5, %v2221_v29  ;;  %1437 = vmatprep.mubr.bf16.mxu1 %v997_v28  ;;  %1341 = vmatmul.mubr.bf16.gmra.mrb[56].mxu0 %v994_v16  ;;  %v965_v45 = vadd.f32 0.5, %v901_v32 }
 0x1ae   : > { %v2225_v34 = vpop.eup %2224  ;;  %v966_v36 = vadd.f32 0.5, %v902_v15  ;;  %v903_v37 = vmul.f32 0.5, %v2223_v31  ;;  %1438 = vmatmul.mubr.bf16.gmra.mrb[56].mxu1 %v996_v22 }
 0x1af   : > { %v968_v39 = vadd.f32 0.5, %v904_v33  ;;  %v905_v41 = vmul.f32 0.5, %v2225_v34 }
 0x1b0   : > { %v967_v43 = vadd.f32 0.5, %v903_v37  ;;  %v998_v44 = vpack.c.bf16 %v966_v36, %v962_v35 }
 0x1b1   : > { %v969_v40 = vadd.f32 0.5, %v905_v41  ;;  %v1000_v47 = vpack.c.bf16 %v968_v39, %v964_v38 }
 0x1b2   : > { %v999_v46 = vpack.c.bf16 %v967_v43, %v963_v42 }
 0x1b3   : > { %v1001_v48 = vpack.c.bf16 %v969_v40, %v965_v45 }
 0x1b4   : > { %1348 = vmatprep.mubr.bf16.mxu0 %v999_v46 }
 0x1b5   : > { %1445 = vmatprep.mubr.bf16.mxu1 %v1001_v48  ;;  %1349 = vmatmul.mubr.bf16.gmra.mrb[60].mxu0 %v998_v44 }
 0x1b6   : > { %1446 = vmatmul.mubr.bf16.gmra.mrb[60].mxu1 %v1000_v47 }
 0x24a   : > { %v1829_v49 = vpop.f32.mrb[32].mxu0 }
 0x24b   : > { %v1830_v51 = vpop.f32.mrb[33].mxu0 }
 0x24c   : > { %v1893_v50 = vpop.f32.mrb[32].mxu1  ;;  %v1831_v52 = vadd.f32 %v1830_v51, %v1829_v49  ;;  %v1832_v54 = vpop.f32.mrb[34].mxu0 }
 0x24d   : > { %v1894_v53 = vpop.f32.mrb[33].mxu1  ;;  %v1833_v57 = vpop.f32.mrb[35].mxu0 }
 0x24e   : > { %v1895_v55 = vadd.f32 %v1894_v53, %v1893_v50  ;;  %v1896_v56 = vpop.f32.mrb[34].mxu1  ;;  %v1834_v58 = vadd.f32 %v1833_v57, %v1832_v54 }
 0x24f   : > { %v1897_v59 = vpop.f32.mrb[35].mxu1 }
 0x250   : > { %v1392_v60 = vadd.f32 %v1895_v55, %v1831_v52  ;;  %v1898_v61 = vadd.f32 %v1897_v59, %v1896_v56 }
 0x252   : > { %v1454_v62 = vmul.f32 0.5, %v1392_v60  ;;  %v1395_v63 = vadd.f32 %v1898_v61, %v1834_v58 }
 0x253   : > { %v1835_v1 = vpop.f32.mrb[36].mxu0 }
 0x254   : > { %2226 = vtanh.f32 %v1454_v62  ;;  %v1455_v0 = vmul.f32 0.5, %v1395_v63  ;;  %v1836_v3 = vpop.f32.mrb[37].mxu0 }
 0x255   : > { %v1899_v2 = vpop.f32.mrb[36].mxu1  ;;  %v1837_v5 = vadd.f32 %v1836_v3, %v1835_v1  ;;  %v1838_v7 = vpop.f32.mrb[38].mxu0 }
 0x256   : > { %2228 = vtanh.f32 %v1455_v0  ;;  %v1900_v4 = vpop.f32.mrb[37].mxu1  ;;  %v1839_v10 = vpop.f32.mrb[39].mxu0 }
 0x257   : > { %v1901_v6 = vadd.f32 %v1900_v4, %v1899_v2  ;;  %v1902_v9 = vpop.f32.mrb[38].mxu1  ;;  %v1840_v13 = vadd.f32 %v1839_v10, %v1838_v7 }
 0x258   : > { %v1903_v11 = vpop.f32.mrb[39].mxu1 }
 0x259   : > { %v1400_v12 = vadd.f32 %v1901_v6, %v1837_v5  ;;  %v1904_v8 = vadd.f32 %v1903_v11, %v1902_v9 }
 0x25b   : > { %v1456_v14 = vmul.f32 0.5, %v1400_v12  ;;  %v1403_v17 = vadd.f32 %v1904_v8, %v1840_v13 }
 0x25d   : > { %2230 = vtanh.f32 %v1456_v14  ;;  %v1457_v16 = vmul.f32 0.5, %v1403_v17  ;;  %v1841_v20 = vpop.f32.mrb[40].mxu0 }
 0x25e   : > { %v2227_v18 = vpop.eup %2226  ;;  %v1905_v22 = vpop.f32.mrb[40].mxu1 }
 0x25f   : > { %v1486_v19 = vmul.f32 0.5, %v2227_v18  ;;  %2232 = vtanh.f32 %v1457_v16  ;;  %v1842_v23 = vpop.f32.mrb[41].mxu0  ;;  %v1906_v26 = vpop.f32.mrb[41].mxu1 }
 0x260   : > { %v2229_v21 = vpop.eup %2228  ;;  %v1843_v25 = vadd.f32 %v1842_v23, %v1841_v20  ;;  %v1844_v27 = vpop.f32.mrb[42].mxu0  ;;  %v1907_v28 = vadd.f32 %v1906_v26, %v1905_v22 }
 0x261   : > { %v1487_v24 = vmul.f32 0.5, %v2229_v21  ;;  %v1908_v29 = vpop.f32.mrb[42].mxu1  ;;  %v1845_v30 = vpop.f32.mrb[43].mxu0  ;;  %v1502_v15 = vadd.f32 0.5, %v1486_v19 }
 0x262   : > { %v1846_v32 = vadd.f32 %v1845_v30, %v1844_v27  ;;  %v1909_v33 = vpop.f32.mrb[43].mxu1  ;;  %v1408_v34 = vadd.f32 %v1907_v28, %v1843_v25 }
 0x263   : > { %v1503_v31 = vadd.f32 0.5, %v1487_v24  ;;  %v1910_v35 = vadd.f32 %v1909_v33, %v1908_v29 }
 0x264   : > { %v1458_v37 = vmul.f32 0.5, %v1408_v34 }
 0x265   : > { %v1518_v36 = vpack.c.bf16 %v1503_v31, %v1502_v15  ;;  %v1411_v38 = vadd.f32 %v1910_v35, %v1846_v32 }
 0x266   : > { %v1847_v39 = vpop.f32.mrb[44].mxu0  ;;  %2234 = vtanh.f32 %v1458_v37 }
 0x267   : > { %1526 = vst [vmem:[#allocation2] sm:$0xff] %v1518_v36  ;;  %v2231_v41 = vpop.eup %2230  ;;  %v1459_v42 = vmul.f32 0.5, %v1411_v38  ;;  %v1911_v43 = vpop.f32.mrb[44].mxu1 }
 0x268   : > { %v1848_v44 = vpop.f32.mrb[45].mxu0  ;;  %v1488_v45 = vmul.f32 0.5, %v2231_v41  ;;  %v1912_v47 = vpop.f32.mrb[45].mxu1 }
 0x269   : > { %v1849_v40 = vadd.f32 %v1848_v44, %v1847_v39  ;;  %v1850_v46 = vpop.f32.mrb[46].mxu0  ;;  %v2233_v48 = vpop.eup %2232  ;;  %2236 = vtanh.f32 %v1459_v42  ;;  %v1913_v49 = vadd.f32 %v1912_v47, %v1911_v43 }
 0x26a   : > { %v1914_v50 = vpop.f32.mrb[46].mxu1  ;;  %v1851_v51 = vpop.f32.mrb[47].mxu0  ;;  %v1489_v52 = vmul.f32 0.5, %v2233_v48  ;;  %v1504_v57 = vadd.f32 0.5, %v1488_v45 }
 0x26b   : > { %v1852_v53 = vadd.f32 %v1851_v51, %v1850_v46  ;;  %v1915_v54 = vpop.f32.mrb[47].mxu1  ;;  %v1416_v55 = vadd.f32 %v1913_v49, %v1849_v40 }
 0x26c   : > { %v1916_v56 = vadd.f32 %v1915_v54, %v1914_v50  ;;  %v1505_v58 = vadd.f32 0.5, %v1489_v52 }
 0x26d   : > { %v1460_v59 = vmul.f32 0.5, %v1416_v55 }
 0x26e   : > { %v1419_v60 = vadd.f32 %v1916_v56, %v1852_v53  ;;  %v1519_v61 = vpack.c.bf16 %v1505_v58, %v1504_v57 }
 0x26f   : > { %v1853_v62 = vpop.f32.mrb[48].mxu0  ;;  %2238 = vtanh.f32 %v1460_v59 }
 0x270   : > { %v1461_v63 = vmul.f32 0.5, %v1419_v60  ;;  %v1917_v0 = vpop.f32.mrb[48].mxu1  ;;  %v1854_v1 = vpop.f32.mrb[49].mxu0  ;;  %1527 = vst [vmem:[#allocation2 + $0x8] sm:$0xff] %v1519_v61 }
 0x271   : > { %v1855_v2 = vadd.f32 %v1854_v1, %v1853_v62  ;;  %v1918_v3 = vpop.f32.mrb[49].mxu1  ;;  %v1856_v4 = vpop.f32.mrb[50].mxu0 }
 0x272   : > { %v2235_v5 = vpop.eup %2234  ;;  %2240 = vtanh.f32 %v1461_v63  ;;  %v1919_v6 = vadd.f32 %v1918_v3, %v1917_v0  ;;  %v1920_v7 = vpop.f32.mrb[50].mxu1 }
 0x273   : > { %v1857_v9 = vpop.f32.mrb[51].mxu0  ;;  %v1490_v10 = vmul.f32 0.5, %v2235_v5  ;;  %v1921_v12 = vpop.f32.mrb[51].mxu1 }
 0x274   : > { %v1858_v11 = vadd.f32 %v1857_v9, %v1856_v4  ;;  %v2237_v13 = vpop.eup %2236  ;;  %v1424_v8 = vadd.f32 %v1919_v6, %v1855_v2  ;;  %v1922_v14 = vadd.f32 %v1921_v12, %v1920_v7 }
 0x275   : > { %v1491_v17 = vmul.f32 0.5, %v2237_v13  ;;  %v1506_v19 = vadd.f32 0.5, %v1490_v10 }
 0x276   : > { %v1462_v18 = vmul.f32 0.5, %v1424_v8  ;;  %v1427_v16 = vadd.f32 %v1922_v14, %v1858_v11 }
 0x277   : > { %v1507_v20 = vadd.f32 0.5, %v1491_v17 }
 0x278   : > { %2242 = vtanh.f32 %v1462_v18  ;;  %v1463_v21 = vmul.f32 0.5, %v1427_v16  ;;  %v1859_v23 = vpop.f32.mrb[52].mxu0 }
 0x279   : > { %v1520_v22 = vpack.c.bf16 %v1507_v20, %v1506_v19  ;;  %v1923_v24 = vpop.f32.mrb[52].mxu1  ;;  %v2239_v25 = vpop.eup %2238 }
 0x27a   : > { %2244 = vtanh.f32 %v1463_v21  ;;  %v1860_v26 = vpop.f32.mrb[53].mxu0  ;;  %v1924_v27 = vpop.f32.mrb[53].mxu1  ;;  %v1492_v28 = vmul.f32 0.5, %v2239_v25 }
 0x27b   : > { %1528 = vst [vmem:[#allocation2 + $0x10] sm:$0xff] %v1520_v22  ;;  %v1861_v29 = vadd.f32 %v1860_v26, %v1859_v23  ;;  %v1925_v30 = vadd.f32 %v1924_v27, %v1923_v24  ;;  %v1862_v15 = vpop.f32.mrb[54].mxu0  ;;  %v1926_v31 = vpop.f32.mrb[54].mxu1 }
 0x27c   : > { %v2241_v32 = vpop.eup %2240  ;;  %v1863_v33 = vpop.f32.mrb[55].mxu0  ;;  %v1508_v39 = vadd.f32 0.5, %v1492_v28 }
 0x27d   : > { %v1927_v34 = vpop.f32.mrb[55].mxu1  ;;  %v1493_v35 = vmul.f32 0.5, %v2241_v32  ;;  %v1432_v36 = vadd.f32 %v1925_v30, %v1861_v29  ;;  %v1864_v37 = vadd.f32 %v1863_v33, %v1862_v15 }
 0x27e   : > { %v1928_v38 = vadd.f32 %v1927_v34, %v1926_v31 }
 0x27f   : > { %v1509_v41 = vadd.f32 0.5, %v1493_v35  ;;  %v1464_v42 = vmul.f32 0.5, %v1432_v36 }
 0x280   : > { %v1435_v43 = vadd.f32 %v1928_v38, %v1864_v37  ;;  %v1865_v45 = vpop.f32.mrb[56].mxu0 }
 0x281   : > { %v1521_v44 = vpack.c.bf16 %v1509_v41, %v1508_v39  ;;  %2246 = vtanh.f32 %v1464_v42  ;;  %v1929_v40 = vpop.f32.mrb[56].mxu1  ;;  %v1866_v48 = vpop.f32.mrb[57].mxu0  ;;  %v1538_v42 = vld [vmem:[#allocation2] sm:$0xff] (!%p1790_p5) }
 0x282   : > { %v2243_v47 = vpop.eup %2242  ;;  %v1465_v46 = vmul.f32 0.5, %v1435_v43  ;;  %v1930_v49 = vpop.f32.mrb[57].mxu1  ;;  %v1867_v51 = vadd.f32 %v1866_v48, %v1865_v45  ;;  %v1539_v43 = vld [vmem:[#allocation2 + $0x8] sm:$0xff] (!%p1790_p5)  ;;  %v1791_v45 = vcombine.low (!%p1790_p5), %v1538_v42, %v1538_v42 }
 0x283   : > { %1529 = vst [vmem:[#allocation2 + $0x18] sm:$0xff] %v1521_v44  ;;  %v1494_v50 = vmul.f32 0.5, %v2243_v47  ;;  %v1931_v52 = vadd.f32 %v1930_v49, %v1929_v40  ;;  %v1868_v53 = vpop.f32.mrb[58].mxu0  ;;  %v1932_v54 = vpop.f32.mrb[58].mxu1  ;;  %v1540_v44 = vld [vmem:[#allocation2 + $0x10] sm:$0xff] (!%p1790_p5)  ;;  %v1792_v40 = vcombine.high (!%p1790_p5), %v1538_v42, %v1538_v42  ;;  %v1793_v47 = vcombine.low (!%p1790_p5), %v1539_v43, %v1539_v43 }
 0x284   : > { %v2245_v55 = vpop.eup %2244  ;;  %2248 = vtanh.f32 %v1465_v46  ;;  %v1869_v56 = vpop.f32.mrb[59].mxu0  ;;  %v1794_v46 = vcombine.high (!%p1790_p5), %v1539_v43, %v1539_v43  ;;  %1602 = vst [vmem:[#allocation9] sm:$0xf] (!%p1790_p5), %v1791_v45 }
 0x285   : > { %v1933_v57 = vpop.f32.mrb[59].mxu1  ;;  %v1495_v58 = vmul.f32 0.5, %v2245_v55  ;;  %v1440_v59 = vadd.f32 %v1931_v52, %v1867_v51  ;;  %v1870_v60 = vadd.f32 %v1869_v56, %v1868_v53  ;;  %v1510_v62 = vadd.f32 0.5, %v1494_v50  ;;  %1603 = vst [vmem:[#allocation9 + $0x4] sm:$0xf] (!%p1790_p5), %v1792_v40 }
 0x286   : > { %v1934_v61 = vadd.f32 %v1933_v57, %v1932_v54  ;;  %v1795_v51 = vcombine.low (!%p1790_p5), %v1540_v44, %v1540_v44  ;;  %v1796_v52 = vcombine.high (!%p1790_p5), %v1540_v44, %v1540_v44  ;;  %1604 = vst [vmem:[#allocation9 + $0x8] sm:$0xf] (!%p1790_p5), %v1793_v47  ;;  %1605 = vst [vmem:[#allocation9 + $0xc] sm:$0xf] (!%p1790_p5), %v1794_v46 }
 0x287   : > { %v1511_v63 = vadd.f32 0.5, %v1495_v58  ;;  %v1466_v0 = vmul.f32 0.5, %v1440_v59 }
 0x288   : > { %v1443_v1 = vadd.f32 %v1934_v61, %v1870_v60  ;;  %v1871_v3 = vpop.f32.mrb[60].mxu0  ;;  %1606 = vst [vmem:[#allocation9 + $0x10] sm:$0xf] (!%p1790_p5), %v1795_v51  ;;  %1607 = vst [vmem:[#allocation9 + $0x14] sm:$0xf] (!%p1790_p5), %v1796_v52 }
 0x289   : > { %v1522_v2 = vpack.c.bf16 %v1511_v63, %v1510_v62  ;;  %2250 = vtanh.f32 %v1466_v0  ;;  %v1935_v4 = vpop.f32.mrb[60].mxu1  ;;  %v1872_v6 = vpop.f32.mrb[61].mxu0 }
 0x28a   : > { %v1467_v5 = vmul.f32 0.5, %v1443_v1  ;;  %v1936_v7 = vpop.f32.mrb[61].mxu1  ;;  %v1873_v10 = vadd.f32 %v1872_v6, %v1871_v3  ;;  %v1874_v12 = vpop.f32.mrb[62].mxu0  ;;  %v1541_v48 = vld [vmem:[#allocation2 + $0x18] sm:$0xff] (!%p1790_p5) }
 0x28b   : > { %v2247_v9 = vpop.eup %2246  ;;  %1530 = vst [vmem:[#allocation2 + $0x20] sm:$0xff] %v1522_v2  ;;  %v1937_v11 = vadd.f32 %v1936_v7, %v1935_v4  ;;  %v1938_v13 = vpop.f32.mrb[62].mxu1  ;;  %v1797_v53 = vcombine.low (!%p1790_p5), %v1541_v48, %v1541_v48  ;;  %v1798_v54 = vcombine.high (!%p1790_p5), %v1541_v48, %v1541_v48 }
 0x28c   : > { %2252 = vtanh.f32 %v1467_v5  ;;  %v1875_v8 = vpop.f32.mrb[63].mxu0  ;;  %v1939_v14 = vpop.f32.mrb[63].mxu1  ;;  %v1496_v17 = vmul.f32 0.5, %v2247_v9 }
 0x28d   : > { %v1448_v18 = vadd.f32 %v1937_v11, %v1873_v10  ;;  %v1876_v16 = vadd.f32 %v1875_v8, %v1874_v12  ;;  %v1940_v19 = vadd.f32 %v1939_v14, %v1938_v13  ;;  %1608 = vst [vmem:[#allocation9 + $0x18] sm:$0xf] (!%p1790_p5), %v1797_v53  ;;  %1609 = vst [vmem:[#allocation9 + $0x1c] sm:$0xf] (!%p1790_p5), %v1798_v54 }
 0x28e   : > { %v2249_v20 = vpop.eup %2248  ;;  %v1512_v24 = vadd.f32 0.5, %v1496_v17 }
 0x28f   : > { %v1497_v21 = vmul.f32 0.5, %v2249_v20  ;;  %v1468_v22 = vmul.f32 0.5, %v1448_v18  ;;  %v1451_v23 = vadd.f32 %v1940_v19, %v1876_v16 }
 0x291   : > { %v1513_v25 = vadd.f32 0.5, %v1497_v21  ;;  %2254 = vtanh.f32 %v1468_v22  ;;  %v1469_v26 = vmul.f32 0.5, %v1451_v23 }
 0x292   : > { %v1542_v49 = vld [vmem:[#allocation2 + $0x20] sm:$0xff] (!%p1790_p5) }
 0x293   : > { %v2251_v27 = vpop.eup %2250  ;;  %v1523_v28 = vpack.c.bf16 %v1513_v25, %v1512_v24  ;;  %2256 = vtanh.f32 %v1469_v26  ;;  %v1799_v57 = vcombine.low (!%p1790_p5), %v1542_v49, %v1542_v49  ;;  %v1800_v58 = vcombine.high (!%p1790_p5), %v1542_v49, %v1542_v49 }
 0x294   : > { %v1498_v29 = vmul.f32 0.5, %v2251_v27 }
 0x295   : > { %1531 = vst [vmem:[#allocation2 + $0x28] sm:$0xff] %v1523_v28  ;;  %1610 = vst [vmem:[#allocation9 + $0x20] sm:$0xf] (!%p1790_p5), %v1799_v57 }
 0x296   : > { %v2253_v30 = vpop.eup %2252  ;;  %v1514_v31 = vadd.f32 0.5, %v1498_v29  ;;  %1611 = vst [vmem:[#allocation9 + $0x24] sm:$0xf] (!%p1790_p5), %v1800_v58 }
 0x297   : > { %v1499_v15 = vmul.f32 0.5, %v2253_v30 }
 0x299   : > { %v1515_v32 = vadd.f32 0.5, %v1499_v15 }
 0x29b   : > { %v2255_v33 = vpop.eup %2254  ;;  %v1524_v34 = vpack.c.bf16 %v1515_v32, %v1514_v31 }
 0x29c   : > { %v1500_v35 = vmul.f32 0.5, %v2255_v33  ;;  %v1543_v50 = vld [vmem:[#allocation2 + $0x28] sm:$0xff] (!%p1790_p5) }
 0x29d   : > { %v2257_v36 = vpop.eup %2256  ;;  %1532 = vst [vmem:[#allocation2 + $0x30] sm:$0xff] %v1524_v34  ;;  %v1801_v59 = vcombine.low (!%p1790_p5), %v1543_v50, %v1543_v50  ;;  %v1802_v60 = vcombine.high (!%p1790_p5), %v1543_v50, %v1543_v50 }
 0x29e   : > { %v1501_v37 = vmul.f32 0.5, %v2257_v36  ;;  %v1516_v38 = vadd.f32 0.5, %v1500_v35  ;;  %1537 = sbr.rel (%p1790_p5) target bundleno = 687 (0x2af), region = 52 }
 0x29f   : > { %1612 = vst [vmem:[#allocation9 + $0x28] sm:$0xf] (!%p1790_p5), %v1801_v59  ;;  %1613 = vst [vmem:[#allocation9 + $0x2c] sm:$0xf] (!%p1790_p5), %v1802_v60 }
 0x2a0   : > { %v1517_v39 = vadd.f32 0.5, %v1501_v37 }
 0x2a2   : > { %v1525_v41 = vpack.c.bf16 %v1517_v39, %v1516_v38 }
 0x2a4   : > { %1533 = vst [vmem:[#allocation2 + $0x38] sm:$0xff] %v1525_v41  ;;  %v1544_v55 = vld [vmem:[#allocation2 + $0x30] sm:$0xff] (!%p1790_p5) }
 0x2a5   : > { %v1803_v61 = vcombine.low %v1544_v55, %v1544_v55  ;;  %v1804_v62 = vcombine.high %v1544_v55, %v1544_v55 }
 0x2a7   : > { %1614 = vst [vmem:[#allocation9 + $0x30] sm:$0xf] %v1803_v61  ;;  %1615 = vst [vmem:[#allocation9 + $0x34] sm:$0xf] %v1804_v62 }
 0x2ab   : > { %v1545_v56 = vld [vmem:[#allocation2 + $0x38] sm:$0xff] }
 0x2ac   : > { %v1805_v63 = vcombine.low %v1545_v56, %v1545_v56  ;;  %v1806_v0 = vcombine.high %v1545_v56, %v1545_v56 }
 0x2ae   : > { %1616 = vst [vmem:[#allocation9 + $0x38] sm:$0xf] %v1805_v63  ;;  %1617 = vst [vmem:[#allocation9 + $0x3c] sm:$0xf] %v1806_v0 }
 0x2af PF: > { %p2690_p10 = scmp.eq.s32.totalorder %s1705_s17, 2  ;;  %s2428_s30 = smov [#allocation9]  }
 0x2b0   : > { %s1627_s28 = sshll.u32 %s2428_s30, 4  ;;  %s1628_s28 = int_to_ptr.vmem [resolvable:$true] %s1627_s28 }
 0x2b1   : > { %s2358_s16 = scalar_lea.vmem %s1628_s28, 1024  ;;  %p2365_p6 = scmp.lt.s32.totalorder %s1628_s28, %s1628_s28 }
 0x2b2   : > { %p2359_p11 = scmp.ne.s32.totalorder %s1628_s28, %s2358_s16  ;;  %p2366_p0 = scmp.lt.s32.totalorder %s2358_s16, %s2358_s16 }
 0x2b4   : > { %p2360_p12 = pnand %p2359_p11, %p2690_p10  ;;  %p2367_p1 = por %p2366_p0, %p2365_p6 }
 0x2b6   : > { %p2361_p13 = pneg %p2360_p12 }
 0x2b8   : > { %p2368_p4 = pnand %p2367_p1, %p2361_p13 }
 0x2ba   : > { %2371 = shalt.err (!%p2368_p4)
}
 0x2bb   : > { %s2372_s17 = scalar_lea.hbm %s2728_s3, 1024 }
 0x2bc   : > { %p2373_p7 = scmp.ne.s32.totalorder %s2728_s3, %s2372_s17  ;;  %p2378_p2 = scmp.lt.u32.totalorder %s2372_s17, %s2728_s3 }
 0x2be   : > { %p2374_p9 = pnand %p2373_p7, %p2690_p10 }
 0x2c0   : > { %p2375_p3 = pneg %p2374_p9 }
 0x2c2   : > { %p2380_p8 = pnand %p2378_p2, %p2375_p3 }
 0x2c4   : > { %2383 = shalt.err (!%p2380_p8)
}
 0x2c5   : > { %s2429_s8 = smov 64   ;;  %s2430_s9 = smov 4  }
 0x2c6   : > { %1954 = dma.vmem_to_hbm [thread:$0]  (%p2690_p10), %s1628_s28, 1024, %s2728_s3, [#allocation5], %s2429_s8, %s2429_s8, %s2430_s9  }
 0x2c7   : > { %2405 = dma.done.wait (%p2690_p10), [#allocation5], 1024  }
 0x2c8   : > { %2407 = vsyncadd (%p2690_p10), [#allocation5], 4294966272 }
 0x2c9 PF: > { %s16_s14 = sadd.s32 1, %s2418_s14   ;;  %s2740_s12 = smov %s2414_s13 }
 0x2ca   : > { %p13_p5 = scmp.ge.s32.totalorder %s16_s14, 5   ;;  %s2741_s13 = smov %s2743_s21 }
 0x2cc   :  { %15 = sbr.rel (!%p13_p5) target bundleno = 4 (0x4), region = 81 }
 0x2d3   :  { %1643 = vsyncpa [#allocation4], 1 }
 0x2d4   :  { %1645 = vsyncpa [#allocation4 + $0x1], 1 }
 0x2d5   :  { %1646 = vsyncpa [#allocation7], 1 }
 0x2d6   :  { %1647 = vsyncpa [#allocation5], 1 }
 0x2d7   :  { %1649 = vsyncpa [#allocation5 + $0x1], 1 }

</bundles_post_ra>
